<compile_context>
chip_gen: v7x
topology: tpu7x:2x2x1
jax: 0.10.0
libtpu: 0.0.40
codegen_flags: <defaults>
</compile_context>

<pallas_src>
import functools

import jax
import jax.numpy as jnp
from jax.experimental import pallas as pl
from jax.experimental.pallas import tpu as pltpu


def _make_kernel(C, H, W, t, use_vpu):
    """Builds the per-image kernel. Shapes/t are static Python ints."""
    HW = H * W

    def kernel(x_ref, masks_ref, w_ref, b_ref, out_ref):
        # x_ref:     (1, C, HW)   one image, channels on sublanes, pixels on lanes
        # masks_ref: (4, 1, HW)   [col dw=-1, col dw=+1, row dh=-1, row dh=+1]
        # w_ref:     (9*C, C, 1)  VPU path: [k*C+ci] -> (C_out, 1) column
        #            (3, C, 3*C)  MXU path: [kh]     -> (C_out, 3*C_in)
        # b_ref:     (C, 1)       BN-folded bias
        # out_ref:   (1, C, HW)

        # ---- loaded once per image, reused across the t+1 unrolled convs ----
        x0 = x_ref[0].astype(jnp.float32)            # (C, HW)
        bias = b_ref[...]                            # (C, 1)
        cm = (masks_ref[0], masks_ref[1])            # column-wrap masks (1, HW)
        rm = (masks_ref[2], masks_ref[3])            # row-wrap masks    (1, HW)

        if use_vpu:
            w_cols = [[w_ref[k * C + ci] for ci in range(C)] for k in range(9)]
        else:
            w_rows = [w_ref[d] for d in range(3)]    # (C_out, 3*C_in) per kernel row

        def channel_mix(k, s):
            # s: (C_in, HW) column-shifted slab -> (C_out, HW), unrolled VPU FMA.
            acc = w_cols[k][0] * s[0:1, :]
            for ci in range(1, C):
                acc = acc + w_cols[k][ci] * s[ci:ci + 1, :]
            return acc

        def conv_bn_relu(cur):
            # Column stage: shifted slabs shared by all three kernel rows.
            # pltpu.roll follows jnp.roll semantics (out[j] = in[j - shift]);
            # the wrapped lanes are zeroed by the column masks.
            cs = (pltpu.roll(cur, 1, axis=1) * cm[0],        # x[.., w-1]
                  cur,                                       # x[.., w  ]
                  pltpu.roll(cur, HW - 1, axis=1) * cm[1])   # x[.., w+1]
            if not use_vpu:
                stacked = jnp.concatenate(cs, axis=0)        # (3*C_in, HW)

            acc = None
            for di, dh in enumerate((-1, 0, 1)):
                if use_vpu:
                    r = None
                    for wi, dw in enumerate((-1, 0, 1)):
                        kk = (dh + 1) * 3 + (dw + 1)
                        contrib = channel_mix(kk, cs[wi])
                        r = contrib if r is None else r + contrib
                else:
                    # Fused K=3*C_in matmul per kernel row (bf16 cast would be a
                    # further win on v6e/v7x at the cost of tolerance).
                    r = jnp.dot(w_rows[di], stacked,
                                preferred_element_type=jnp.float32)
                # Row stage: shift whole rows; wrapped rows zeroed by row masks.
                if dh == -1:
                    r = pltpu.roll(r, W, axis=1) * rm[0]
                elif dh == 1:
                    r = pltpu.roll(r, HW - W, axis=1) * rm[1]
                acc = r if acc is None else acc + r
            return jnp.maximum(acc + bias, 0.0)

        # Recurrence: x1 = f(x); then t times x1 = f(x + x1)
        # (== PyTorch loop: i==0 does f(x) then f(x+x1); i>0 does f(x+x1)).
        x1 = conv_bn_relu(x0)
        for _ in range(t):
            x1 = conv_bn_relu(x0 + x1)

        out_ref[0] = x1.astype(out_ref.dtype)

    return kernel


def _fold_bn(w, b, gamma, beta, mean, var, eps=1e-5):
    """Fold eval-mode BatchNorm into a conv. w: (C_out, C_in, 3, 3), b: (C_out,)."""
    scale = gamma / jnp.sqrt(var + eps)                  # (C_out,)
    w_eff = w * scale[:, None, None, None]
    b_eff = (b - mean) * scale + beta
    return w_eff, b_eff


def _build_masks(H, W):
    """(4, 1, H*W) f32 masks: [col dw=-1, col dw=+1, row dh=-1, row dh=+1]."""
    hh = jnp.broadcast_to(jnp.arange(H)[:, None], (H, W)).reshape(1, H * W)
    ww = jnp.broadcast_to(jnp.arange(W)[None, :], (H, W)).reshape(1, H * W)
    cm_m1 = (ww >= 1).astype(jnp.float32)        # source column w-1 valid
    cm_p1 = (ww <= W - 2).astype(jnp.float32)    # source column w+1 valid
    rm_m1 = (hh >= 1).astype(jnp.float32)        # source row h-1 valid
    rm_p1 = (hh <= H - 2).astype(jnp.float32)    # source row h+1 valid
    return jnp.stack([cm_m1, cm_p1, rm_m1, rm_p1], axis=0)


@functools.partial(jax.jit, static_argnames=("t",))
def recurrent_block_r2u(x, params, t=2):
    """x: (N, C, H, W) float32. Returns the recurrent block output, same shape."""
    N, C, H, W = x.shape
    HW = H * W

    w_eff, b_eff = _fold_bn(params["w"], params["b"], params["gamma"],
                            params["beta"], params["mean"], params["var"])

    use_vpu = C <= 8
    if use_vpu:
        # (C_out, C_in, 3, 3) -> (9*C_in, C_out, 1): one lane-broadcastable
        # weight column per (tap, input-channel) pair; tap k = kh*3 + kw.
        w_pack = jnp.transpose(w_eff, (2, 3, 1, 0)).reshape(9 * C, C, 1)
    else:
        # (3, C_out, 3*C_in): one fused matmul per kernel row kh, columns
        # ordered [kw=0 | kw=1 | kw=2] x C_in.
        w_pack = jnp.transpose(w_eff, (2, 0, 3, 1)).reshape(3, C, 3 * C)

    masks = _build_masks(H, W)          # (4, 1, HW)
    b_col = b_eff.reshape(C, 1)

    # NCHW kept: channels -> sublanes, flattened pixels -> lanes (no transpose).
    x2 = x.reshape(N, C, HW)

    kernel = _make_kernel(C, H, W, t, use_vpu)

    # VMEM budget derived from the actual per-image footprint (double-buffered
    # in/out + masks/weights + live f32 temporaries), clamped to a safe range.
    per_image_bytes = 4 * C * HW
    vmem_limit = int(min(max(16 * 1024 * 1024, 48 * per_image_bytes),
                         32 * 1024 * 1024))

    out2 = pl.pallas_call(
        kernel,
        out_shape=jax.ShapeDtypeStruct((N, C, HW), x.dtype),
        grid_spec=pltpu.PrefetchScalarGridSpec(
            num_scalar_prefetch=0,
            grid=(N,),
            in_specs=[
                pl.BlockSpec((1, C, HW), lambda n: (n, 0, 0)),      # image n
                pl.BlockSpec(masks.shape, lambda n: (0, 0, 0)),     # masks
                pl.BlockSpec(w_pack.shape, lambda n: (0,) * w_pack.ndim),
                pl.BlockSpec((C, 1), lambda n: (0, 0)),             # bias
            ],
            out_specs=pl.BlockSpec((1, C, HW), lambda n: (n, 0, 0)),
        ),
        compiler_params=pltpu.CompilerParams(
            dimension_semantics=("parallel",),
            vmem_limit_bytes=vmem_limit),
    )(x2, masks, w_pack, b_col)

    return out2.reshape(N, C, H, W)


def _reference(x, params, t=2):
    """Pure-JAX reference with the same eval-mode BN folding."""
    w_eff, b_eff = _fold_bn(params["w"], params["b"], params["gamma"],
                            params["beta"], params["mean"], params["var"])

    def f(z):
        y = jax.lax.conv_general_dilated(
            z, w_eff, window_strides=(1, 1), padding="SAME",
            dimension_numbers=("NCHW", "OIHW", "NCHW"),
            precision=jax.lax.Precision.HIGHEST)
        return jnp.maximum(y + b_eff[None, :, None, None], 0.0)

    x1 = None
    for i in range(t):          # exactly the PyTorch loop
        if i == 0:
            x1 = f(x)
        x1 = f(x + x1)
    return x1


if __name__ == "__main__":
    # Small shapes consistent with the module: batch=2, ch_out=4, spatial 16x16, t=2.
    N, C, H, W, t = 2, 4, 16, 16, 2

    key = jax.random.PRNGKey(0)
    kx, kw, kb, kg, kbe, km, kv = jax.random.split(key, 7)
    x = jax.random.normal(kx, (N, C, H, W), jnp.float32)
    params = {
        "w": jax.random.normal(kw, (C, C, 3, 3), jnp.float32) * 0.1,
        "b": jax.random.normal(kb, (C,), jnp.float32) * 0.1,
        # Non-trivial eval-mode BN stats so the fold is actually exercised.
        "gamma": 1.0 + 0.1 * jax.random.normal(kg, (C,), jnp.float32),
        "beta": 0.1 * jax.random.normal(kbe, (C,), jnp.float32),
        "mean": 0.1 * jax.random.normal(km, (C,), jnp.float32),
        "var": 1.0 + 0.5 * jax.random.uniform(kv, (C,), jnp.float32),
    }

    out = recurrent_block_r2u(x, params, t=t)
    out = jax.block_until_ready(out)

    ref = _reference(x, params, t=t)
    assert out.shape == (N, C, H, W)
    max_err = float(jnp.max(jnp.abs(out - ref)))
    assert jnp.allclose(out, ref, atol=1e-4, rtol=1e-4), f"mismatch vs reference: {max_err}"

    print("KERNEL_OK")
</pallas_src>

<mosaic_0001>
module attributes {stable_mosaic.version = 11 : i64} {
  func.func @kernel(%arg0: i32, %arg1: memref<1x4x256xf32, #tpu.memory_space<vmem>>, %arg2: memref<4x1x256xf32, #tpu.memory_space<vmem>>, %arg3: memref<36x4x1xf32, #tpu.memory_space<vmem>>, %arg4: memref<4x1xf32, #tpu.memory_space<vmem>>, %arg5: memref<1x4x256xf32, #tpu.memory_space<vmem>>) attributes {dimension_semantics = [#tpu.dimension_semantics<parallel>], iteration_bounds = array<i64: 2>, scalar_prefetch = 0 : i64, scratch_operands = 0 : i64, tpu.core_type = #tpu.core_type<tc>, window_params = [{transform_indices = @transform_0, window_bounds = array<i64: 1, 4, 256>}, {pipeline_mode = #tpu.pipeline_mode<synchronous>, transform_indices = @transform_1, window_bounds = array<i64: 4, 1, 256>}, {pipeline_mode = #tpu.pipeline_mode<synchronous>, transform_indices = @transform_2, window_bounds = array<i64: 36, 4, 1>}, {pipeline_mode = #tpu.pipeline_mode<synchronous>, transform_indices = @transform_3, window_bounds = array<i64: 4, 1>}, {transform_indices = @transform_4, window_bounds = array<i64: 1, 4, 256>}]} {
    %c0 = arith.constant 0 : index
    %c0_0 = arith.constant 0 : index
    %c0_1 = arith.constant 0 : index
    %0 = vector.load %arg1[%c0, %c0_0, %c0_1] : memref<1x4x256xf32, #tpu.memory_space<vmem>>, vector<1x4x256xf32>
    %1 = vector.shape_cast %0 : vector<1x4x256xf32> to vector<4x256xf32>
    %c0_2 = arith.constant 0 : index
    %c0_3 = arith.constant 0 : index
    %2 = vector.load %arg4[%c0_2, %c0_3] : memref<4x1xf32, #tpu.memory_space<vmem>>, vector<4x1xf32>
    %c0_4 = arith.constant 0 : index
    %c0_5 = arith.constant 0 : index
    %c0_6 = arith.constant 0 : index
    %3 = vector.load %arg2[%c0_4, %c0_5, %c0_6] : memref<4x1x256xf32, #tpu.memory_space<vmem>>, vector<1x1x256xf32>
    %4 = vector.shape_cast %3 : vector<1x1x256xf32> to vector<1x256xf32>
    %c1 = arith.constant 1 : index
    %c0_7 = arith.constant 0 : index
    %c0_8 = arith.constant 0 : index
    %5 = vector.load %arg2[%c1, %c0_7, %c0_8] : memref<4x1x256xf32, #tpu.memory_space<vmem>>, vector<1x1x256xf32>
    %6 = vector.shape_cast %5 : vector<1x1x256xf32> to vector<1x256xf32>
    %c2 = arith.constant 2 : index
    %c0_9 = arith.constant 0 : index
    %c0_10 = arith.constant 0 : index
    %7 = vector.load %arg2[%c2, %c0_9, %c0_10] : memref<4x1x256xf32, #tpu.memory_space<vmem>>, vector<1x1x256xf32>
    %8 = vector.shape_cast %7 : vector<1x1x256xf32> to vector<1x256xf32>
    %c3 = arith.constant 3 : index
    %c0_11 = arith.constant 0 : index
    %c0_12 = arith.constant 0 : index
    %9 = vector.load %arg2[%c3, %c0_11, %c0_12] : memref<4x1x256xf32, #tpu.memory_space<vmem>>, vector<1x1x256xf32>
    %10 = vector.shape_cast %9 : vector<1x1x256xf32> to vector<1x256xf32>
    %c0_13 = arith.constant 0 : index
    %c0_14 = arith.constant 0 : index
    %c0_15 = arith.constant 0 : index
    %11 = vector.load %arg3[%c0_13, %c0_14, %c0_15] : memref<36x4x1xf32, #tpu.memory_space<vmem>>, vector<1x4x1xf32>
    %12 = vector.shape_cast %11 : vector<1x4x1xf32> to vector<4x1xf32>
    %c1_16 = arith.constant 1 : index
    %c0_17 = arith.constant 0 : index
    %c0_18 = arith.constant 0 : index
    %13 = vector.load %arg3[%c1_16, %c0_17, %c0_18] : memref<36x4x1xf32, #tpu.memory_space<vmem>>, vector<1x4x1xf32>
    %14 = vector.shape_cast %13 : vector<1x4x1xf32> to vector<4x1xf32>
    %c2_19 = arith.constant 2 : index
    %c0_20 = arith.constant 0 : index
    %c0_21 = arith.constant 0 : index
    %15 = vector.load %arg3[%c2_19, %c0_20, %c0_21] : memref<36x4x1xf32, #tpu.memory_space<vmem>>, vector<1x4x1xf32>
    %16 = vector.shape_cast %15 : vector<1x4x1xf32> to vector<4x1xf32>
    %c3_22 = arith.constant 3 : index
    %c0_23 = arith.constant 0 : index
    %c0_24 = arith.constant 0 : index
    %17 = vector.load %arg3[%c3_22, %c0_23, %c0_24] : memref<36x4x1xf32, #tpu.memory_space<vmem>>, vector<1x4x1xf32>
    %18 = vector.shape_cast %17 : vector<1x4x1xf32> to vector<4x1xf32>
    %c4 = arith.constant 4 : index
    %c0_25 = arith.constant 0 : index
    %c0_26 = arith.constant 0 : index
    %19 = vector.load %arg3[%c4, %c0_25, %c0_26] : memref<36x4x1xf32, #tpu.memory_space<vmem>>, vector<1x4x1xf32>
    %20 = vector.shape_cast %19 : vector<1x4x1xf32> to vector<4x1xf32>
    %c5 = arith.constant 5 : index
    %c0_27 = arith.constant 0 : index
    %c0_28 = arith.constant 0 : index
    %21 = vector.load %arg3[%c5, %c0_27, %c0_28] : memref<36x4x1xf32, #tpu.memory_space<vmem>>, vector<1x4x1xf32>
    %22 = vector.shape_cast %21 : vector<1x4x1xf32> to vector<4x1xf32>
    %c6 = arith.constant 6 : index
    %c0_29 = arith.constant 0 : index
    %c0_30 = arith.constant 0 : index
    %23 = vector.load %arg3[%c6, %c0_29, %c0_30] : memref<36x4x1xf32, #tpu.memory_space<vmem>>, vector<1x4x1xf32>
    %24 = vector.shape_cast %23 : vector<1x4x1xf32> to vector<4x1xf32>
    %c7 = arith.constant 7 : index
    %c0_31 = arith.constant 0 : index
    %c0_32 = arith.constant 0 : index
    %25 = vector.load %arg3[%c7, %c0_31, %c0_32] : memref<36x4x1xf32, #tpu.memory_space<vmem>>, vector<1x4x1xf32>
    %26 = vector.shape_cast %25 : vector<1x4x1xf32> to vector<4x1xf32>
    %c8 = arith.constant 8 : index
    %c0_33 = arith.constant 0 : index
    %c0_34 = arith.constant 0 : index
    %27 = vector.load %arg3[%c8, %c0_33, %c0_34] : memref<36x4x1xf32, #tpu.memory_space<vmem>>, vector<1x4x1xf32>
    %28 = vector.shape_cast %27 : vector<1x4x1xf32> to vector<4x1xf32>
    %c9 = arith.constant 9 : index
    %c0_35 = arith.constant 0 : index
    %c0_36 = arith.constant 0 : index
    %29 = vector.load %arg3[%c9, %c0_35, %c0_36] : memref<36x4x1xf32, #tpu.memory_space<vmem>>, vector<1x4x1xf32>
    %30 = vector.shape_cast %29 : vector<1x4x1xf32> to vector<4x1xf32>
    %c10 = arith.constant 10 : index
    %c0_37 = arith.constant 0 : index
    %c0_38 = arith.constant 0 : index
    %31 = vector.load %arg3[%c10, %c0_37, %c0_38] : memref<36x4x1xf32, #tpu.memory_space<vmem>>, vector<1x4x1xf32>
    %32 = vector.shape_cast %31 : vector<1x4x1xf32> to vector<4x1xf32>
    %c11 = arith.constant 11 : index
    %c0_39 = arith.constant 0 : index
    %c0_40 = arith.constant 0 : index
    %33 = vector.load %arg3[%c11, %c0_39, %c0_40] : memref<36x4x1xf32, #tpu.memory_space<vmem>>, vector<1x4x1xf32>
    %34 = vector.shape_cast %33 : vector<1x4x1xf32> to vector<4x1xf32>
    %c12 = arith.constant 12 : index
    %c0_41 = arith.constant 0 : index
    %c0_42 = arith.constant 0 : index
    %35 = vector.load %arg3[%c12, %c0_41, %c0_42] : memref<36x4x1xf32, #tpu.memory_space<vmem>>, vector<1x4x1xf32>
    %36 = vector.shape_cast %35 : vector<1x4x1xf32> to vector<4x1xf32>
    %c13 = arith.constant 13 : index
    %c0_43 = arith.constant 0 : index
    %c0_44 = arith.constant 0 : index
    %37 = vector.load %arg3[%c13, %c0_43, %c0_44] : memref<36x4x1xf32, #tpu.memory_space<vmem>>, vector<1x4x1xf32>
    %38 = vector.shape_cast %37 : vector<1x4x1xf32> to vector<4x1xf32>
    %c14 = arith.constant 14 : index
    %c0_45 = arith.constant 0 : index
    %c0_46 = arith.constant 0 : index
    %39 = vector.load %arg3[%c14, %c0_45, %c0_46] : memref<36x4x1xf32, #tpu.memory_space<vmem>>, vector<1x4x1xf32>
    %40 = vector.shape_cast %39 : vector<1x4x1xf32> to vector<4x1xf32>
    %c15 = arith.constant 15 : index
    %c0_47 = arith.constant 0 : index
    %c0_48 = arith.constant 0 : index
    %41 = vector.load %arg3[%c15, %c0_47, %c0_48] : memref<36x4x1xf32, #tpu.memory_space<vmem>>, vector<1x4x1xf32>
    %42 = vector.shape_cast %41 : vector<1x4x1xf32> to vector<4x1xf32>
    %c16 = arith.constant 16 : index
    %c0_49 = arith.constant 0 : index
    %c0_50 = arith.constant 0 : index
    %43 = vector.load %arg3[%c16, %c0_49, %c0_50] : memref<36x4x1xf32, #tpu.memory_space<vmem>>, vector<1x4x1xf32>
    %44 = vector.shape_cast %43 : vector<1x4x1xf32> to vector<4x1xf32>
    %c17 = arith.constant 17 : index
    %c0_51 = arith.constant 0 : index
    %c0_52 = arith.constant 0 : index
    %45 = vector.load %arg3[%c17, %c0_51, %c0_52] : memref<36x4x1xf32, #tpu.memory_space<vmem>>, vector<1x4x1xf32>
    %46 = vector.shape_cast %45 : vector<1x4x1xf32> to vector<4x1xf32>
    %c18 = arith.constant 18 : index
    %c0_53 = arith.constant 0 : index
    %c0_54 = arith.constant 0 : index
    %47 = vector.load %arg3[%c18, %c0_53, %c0_54] : memref<36x4x1xf32, #tpu.memory_space<vmem>>, vector<1x4x1xf32>
    %48 = vector.shape_cast %47 : vector<1x4x1xf32> to vector<4x1xf32>
    %c19 = arith.constant 19 : index
    %c0_55 = arith.constant 0 : index
    %c0_56 = arith.constant 0 : index
    %49 = vector.load %arg3[%c19, %c0_55, %c0_56] : memref<36x4x1xf32, #tpu.memory_space<vmem>>, vector<1x4x1xf32>
    %50 = vector.shape_cast %49 : vector<1x4x1xf32> to vector<4x1xf32>
    %c20 = arith.constant 20 : index
    %c0_57 = arith.constant 0 : index
    %c0_58 = arith.constant 0 : index
    %51 = vector.load %arg3[%c20, %c0_57, %c0_58] : memref<36x4x1xf32, #tpu.memory_space<vmem>>, vector<1x4x1xf32>
    %52 = vector.shape_cast %51 : vector<1x4x1xf32> to vector<4x1xf32>
    %c21 = arith.constant 21 : index
    %c0_59 = arith.constant 0 : index
    %c0_60 = arith.constant 0 : index
    %53 = vector.load %arg3[%c21, %c0_59, %c0_60] : memref<36x4x1xf32, #tpu.memory_space<vmem>>, vector<1x4x1xf32>
    %54 = vector.shape_cast %53 : vector<1x4x1xf32> to vector<4x1xf32>
    %c22 = arith.constant 22 : index
    %c0_61 = arith.constant 0 : index
    %c0_62 = arith.constant 0 : index
    %55 = vector.load %arg3[%c22, %c0_61, %c0_62] : memref<36x4x1xf32, #tpu.memory_space<vmem>>, vector<1x4x1xf32>
    %56 = vector.shape_cast %55 : vector<1x4x1xf32> to vector<4x1xf32>
    %c23 = arith.constant 23 : index
    %c0_63 = arith.constant 0 : index
    %c0_64 = arith.constant 0 : index
    %57 = vector.load %arg3[%c23, %c0_63, %c0_64] : memref<36x4x1xf32, #tpu.memory_space<vmem>>, vector<1x4x1xf32>
    %58 = vector.shape_cast %57 : vector<1x4x1xf32> to vector<4x1xf32>
    %c24 = arith.constant 24 : index
    %c0_65 = arith.constant 0 : index
    %c0_66 = arith.constant 0 : index
    %59 = vector.load %arg3[%c24, %c0_65, %c0_66] : memref<36x4x1xf32, #tpu.memory_space<vmem>>, vector<1x4x1xf32>
    %60 = vector.shape_cast %59 : vector<1x4x1xf32> to vector<4x1xf32>
    %c25 = arith.constant 25 : index
    %c0_67 = arith.constant 0 : index
    %c0_68 = arith.constant 0 : index
    %61 = vector.load %arg3[%c25, %c0_67, %c0_68] : memref<36x4x1xf32, #tpu.memory_space<vmem>>, vector<1x4x1xf32>
    %62 = vector.shape_cast %61 : vector<1x4x1xf32> to vector<4x1xf32>
    %c26 = arith.constant 26 : index
    %c0_69 = arith.constant 0 : index
    %c0_70 = arith.constant 0 : index
    %63 = vector.load %arg3[%c26, %c0_69, %c0_70] : memref<36x4x1xf32, #tpu.memory_space<vmem>>, vector<1x4x1xf32>
    %64 = vector.shape_cast %63 : vector<1x4x1xf32> to vector<4x1xf32>
    %c27 = arith.constant 27 : index
    %c0_71 = arith.constant 0 : index
    %c0_72 = arith.constant 0 : index
    %65 = vector.load %arg3[%c27, %c0_71, %c0_72] : memref<36x4x1xf32, #tpu.memory_space<vmem>>, vector<1x4x1xf32>
    %66 = vector.shape_cast %65 : vector<1x4x1xf32> to vector<4x1xf32>
    %c28 = arith.constant 28 : index
    %c0_73 = arith.constant 0 : index
    %c0_74 = arith.constant 0 : index
    %67 = vector.load %arg3[%c28, %c0_73, %c0_74] : memref<36x4x1xf32, #tpu.memory_space<vmem>>, vector<1x4x1xf32>
    %68 = vector.shape_cast %67 : vector<1x4x1xf32> to vector<4x1xf32>
    %c29 = arith.constant 29 : index
    %c0_75 = arith.constant 0 : index
    %c0_76 = arith.constant 0 : index
    %69 = vector.load %arg3[%c29, %c0_75, %c0_76] : memref<36x4x1xf32, #tpu.memory_space<vmem>>, vector<1x4x1xf32>
    %70 = vector.shape_cast %69 : vector<1x4x1xf32> to vector<4x1xf32>
    %c30 = arith.constant 30 : index
    %c0_77 = arith.constant 0 : index
    %c0_78 = arith.constant 0 : index
    %71 = vector.load %arg3[%c30, %c0_77, %c0_78] : memref<36x4x1xf32, #tpu.memory_space<vmem>>, vector<1x4x1xf32>
    %72 = vector.shape_cast %71 : vector<1x4x1xf32> to vector<4x1xf32>
    %c31 = arith.constant 31 : index
    %c0_79 = arith.constant 0 : index
    %c0_80 = arith.constant 0 : index
    %73 = vector.load %arg3[%c31, %c0_79, %c0_80] : memref<36x4x1xf32, #tpu.memory_space<vmem>>, vector<1x4x1xf32>
    %74 = vector.shape_cast %73 : vector<1x4x1xf32> to vector<4x1xf32>
    %c32 = arith.constant 32 : index
    %c0_81 = arith.constant 0 : index
    %c0_82 = arith.constant 0 : index
    %75 = vector.load %arg3[%c32, %c0_81, %c0_82] : memref<36x4x1xf32, #tpu.memory_space<vmem>>, vector<1x4x1xf32>
    %76 = vector.shape_cast %75 : vector<1x4x1xf32> to vector<4x1xf32>
    %c33 = arith.constant 33 : index
    %c0_83 = arith.constant 0 : index
    %c0_84 = arith.constant 0 : index
    %77 = vector.load %arg3[%c33, %c0_83, %c0_84] : memref<36x4x1xf32, #tpu.memory_space<vmem>>, vector<1x4x1xf32>
    %78 = vector.shape_cast %77 : vector<1x4x1xf32> to vector<4x1xf32>
    %c34 = arith.constant 34 : index
    %c0_85 = arith.constant 0 : index
    %c0_86 = arith.constant 0 : index
    %79 = vector.load %arg3[%c34, %c0_85, %c0_86] : memref<36x4x1xf32, #tpu.memory_space<vmem>>, vector<1x4x1xf32>
    %80 = vector.shape_cast %79 : vector<1x4x1xf32> to vector<4x1xf32>
    %c35 = arith.constant 35 : index
    %c0_87 = arith.constant 0 : index
    %c0_88 = arith.constant 0 : index
    %81 = vector.load %arg3[%c35, %c0_87, %c0_88] : memref<36x4x1xf32, #tpu.memory_space<vmem>>, vector<1x4x1xf32>
    %82 = vector.shape_cast %81 : vector<1x4x1xf32> to vector<4x1xf32>
    %c1_i32 = arith.constant 1 : i32
    %83 = tpu.dynamic_rotate %1 by %c1_i32 dim 1 : vector<4x256xf32>, i32 -> vector<4x256xf32>
    %84 = vector.broadcast %4 : vector<1x256xf32> to vector<4x256xf32>
    %85 = arith.mulf %83, %84 : vector<4x256xf32>
    %c255_i32 = arith.constant 255 : i32
    %86 = tpu.dynamic_rotate %1 by %c255_i32 dim 1 : vector<4x256xf32>, i32 -> vector<4x256xf32>
    %87 = vector.broadcast %6 : vector<1x256xf32> to vector<4x256xf32>
    %88 = arith.mulf %86, %87 : vector<4x256xf32>
    %89 = vector.extract_strided_slice %85 {offsets = [0, 0], sizes = [1, 256], strides = [1, 1]} : vector<4x256xf32> to vector<1x256xf32>
    %90 = vector.broadcast %12 : vector<4x1xf32> to vector<4x256xf32>
    %91 = vector.broadcast %89 : vector<1x256xf32> to vector<4x256xf32>
    %92 = arith.mulf %90, %91 : vector<4x256xf32>
    %93 = vector.extract_strided_slice %85 {offsets = [1, 0], sizes = [1, 256], strides = [1, 1]} : vector<4x256xf32> to vector<1x256xf32>
    %94 = vector.broadcast %14 : vector<4x1xf32> to vector<4x256xf32>
    %95 = vector.broadcast %93 : vector<1x256xf32> to vector<4x256xf32>
    %96 = arith.mulf %94, %95 : vector<4x256xf32>
    %97 = arith.addf %92, %96 : vector<4x256xf32>
    %98 = vector.extract_strided_slice %85 {offsets = [2, 0], sizes = [1, 256], strides = [1, 1]} : vector<4x256xf32> to vector<1x256xf32>
    %99 = vector.broadcast %16 : vector<4x1xf32> to vector<4x256xf32>
    %100 = vector.broadcast %98 : vector<1x256xf32> to vector<4x256xf32>
    %101 = arith.mulf %99, %100 : vector<4x256xf32>
    %102 = arith.addf %97, %101 : vector<4x256xf32>
    %103 = vector.extract_strided_slice %85 {offsets = [3, 0], sizes = [1, 256], strides = [1, 1]} : vector<4x256xf32> to vector<1x256xf32>
    %104 = vector.broadcast %18 : vector<4x1xf32> to vector<4x256xf32>
    %105 = vector.broadcast %103 : vector<1x256xf32> to vector<4x256xf32>
    %106 = arith.mulf %104, %105 : vector<4x256xf32>
    %107 = arith.addf %102, %106 : vector<4x256xf32>
    %108 = vector.extract_strided_slice %1 {offsets = [0, 0], sizes = [1, 256], strides = [1, 1]} : vector<4x256xf32> to vector<1x256xf32>
    %109 = vector.broadcast %20 : vector<4x1xf32> to vector<4x256xf32>
    %110 = vector.broadcast %108 : vector<1x256xf32> to vector<4x256xf32>
    %111 = arith.mulf %109, %110 : vector<4x256xf32>
    %112 = vector.extract_strided_slice %1 {offsets = [1, 0], sizes = [1, 256], strides = [1, 1]} : vector<4x256xf32> to vector<1x256xf32>
    %113 = vector.broadcast %22 : vector<4x1xf32> to vector<4x256xf32>
    %114 = vector.broadcast %112 : vector<1x256xf32> to vector<4x256xf32>
    %115 = arith.mulf %113, %114 : vector<4x256xf32>
    %116 = arith.addf %111, %115 : vector<4x256xf32>
    %117 = vector.extract_strided_slice %1 {offsets = [2, 0], sizes = [1, 256], strides = [1, 1]} : vector<4x256xf32> to vector<1x256xf32>
    %118 = vector.broadcast %24 : vector<4x1xf32> to vector<4x256xf32>
    %119 = vector.broadcast %117 : vector<1x256xf32> to vector<4x256xf32>
    %120 = arith.mulf %118, %119 : vector<4x256xf32>
    %121 = arith.addf %116, %120 : vector<4x256xf32>
    %122 = vector.extract_strided_slice %1 {offsets = [3, 0], sizes = [1, 256], strides = [1, 1]} : vector<4x256xf32> to vector<1x256xf32>
    %123 = vector.broadcast %26 : vector<4x1xf32> to vector<4x256xf32>
    %124 = vector.broadcast %122 : vector<1x256xf32> to vector<4x256xf32>
    %125 = arith.mulf %123, %124 : vector<4x256xf32>
    %126 = arith.addf %121, %125 : vector<4x256xf32>
    %127 = arith.addf %107, %126 : vector<4x256xf32>
    %128 = vector.extract_strided_slice %88 {offsets = [0, 0], sizes = [1, 256], strides = [1, 1]} : vector<4x256xf32> to vector<1x256xf32>
    %129 = vector.broadcast %28 : vector<4x1xf32> to vector<4x256xf32>
    %130 = vector.broadcast %128 : vector<1x256xf32> to vector<4x256xf32>
    %131 = arith.mulf %129, %130 : vector<4x256xf32>
    %132 = vector.extract_strided_slice %88 {offsets = [1, 0], sizes = [1, 256], strides = [1, 1]} : vector<4x256xf32> to vector<1x256xf32>
    %133 = vector.broadcast %30 : vector<4x1xf32> to vector<4x256xf32>
    %134 = vector.broadcast %132 : vector<1x256xf32> to vector<4x256xf32>
    %135 = arith.mulf %133, %134 : vector<4x256xf32>
    %136 = arith.addf %131, %135 : vector<4x256xf32>
    %137 = vector.extract_strided_slice %88 {offsets = [2, 0], sizes = [1, 256], strides = [1, 1]} : vector<4x256xf32> to vector<1x256xf32>
    %138 = vector.broadcast %32 : vector<4x1xf32> to vector<4x256xf32>
    %139 = vector.broadcast %137 : vector<1x256xf32> to vector<4x256xf32>
    %140 = arith.mulf %138, %139 : vector<4x256xf32>
    %141 = arith.addf %136, %140 : vector<4x256xf32>
    %142 = vector.extract_strided_slice %88 {offsets = [3, 0], sizes = [1, 256], strides = [1, 1]} : vector<4x256xf32> to vector<1x256xf32>
    %143 = vector.broadcast %34 : vector<4x1xf32> to vector<4x256xf32>
    %144 = vector.broadcast %142 : vector<1x256xf32> to vector<4x256xf32>
    %145 = arith.mulf %143, %144 : vector<4x256xf32>
    %146 = arith.addf %141, %145 : vector<4x256xf32>
    %147 = arith.addf %127, %146 : vector<4x256xf32>
    %c16_i32 = arith.constant 16 : i32
    %148 = tpu.dynamic_rotate %147 by %c16_i32 dim 1 : vector<4x256xf32>, i32 -> vector<4x256xf32>
    %149 = vector.broadcast %8 : vector<1x256xf32> to vector<4x256xf32>
    %150 = arith.mulf %148, %149 : vector<4x256xf32>
    %151 = vector.extract_strided_slice %85 {offsets = [0, 0], sizes = [1, 256], strides = [1, 1]} : vector<4x256xf32> to vector<1x256xf32>
    %152 = vector.broadcast %36 : vector<4x1xf32> to vector<4x256xf32>
    %153 = vector.broadcast %151 : vector<1x256xf32> to vector<4x256xf32>
    %154 = arith.mulf %152, %153 : vector<4x256xf32>
    %155 = vector.extract_strided_slice %85 {offsets = [1, 0], sizes = [1, 256], strides = [1, 1]} : vector<4x256xf32> to vector<1x256xf32>
    %156 = vector.broadcast %38 : vector<4x1xf32> to vector<4x256xf32>
    %157 = vector.broadcast %155 : vector<1x256xf32> to vector<4x256xf32>
    %158 = arith.mulf %156, %157 : vector<4x256xf32>
    %159 = arith.addf %154, %158 : vector<4x256xf32>
    %160 = vector.extract_strided_slice %85 {offsets = [2, 0], sizes = [1, 256], strides = [1, 1]} : vector<4x256xf32> to vector<1x256xf32>
    %161 = vector.broadcast %40 : vector<4x1xf32> to vector<4x256xf32>
    %162 = vector.broadcast %160 : vector<1x256xf32> to vector<4x256xf32>
    %163 = arith.mulf %161, %162 : vector<4x256xf32>
    %164 = arith.addf %159, %163 : vector<4x256xf32>
    %165 = vector.extract_strided_slice %85 {offsets = [3, 0], sizes = [1, 256], strides = [1, 1]} : vector<4x256xf32> to vector<1x256xf32>
    %166 = vector.broadcast %42 : vector<4x1xf32> to vector<4x256xf32>
    %167 = vector.broadcast %165 : vector<1x256xf32> to vector<4x256xf32>
    %168 = arith.mulf %166, %167 : vector<4x256xf32>
    %169 = arith.addf %164, %168 : vector<4x256xf32>
    %170 = vector.extract_strided_slice %1 {offsets = [0, 0], sizes = [1, 256], strides = [1, 1]} : vector<4x256xf32> to vector<1x256xf32>
    %171 = vector.broadcast %44 : vector<4x1xf32> to vector<4x256xf32>
    %172 = vector.broadcast %170 : vector<1x256xf32> to vector<4x256xf32>
    %173 = arith.mulf %171, %172 : vector<4x256xf32>
    %174 = vector.extract_strided_slice %1 {offsets = [1, 0], sizes = [1, 256], strides = [1, 1]} : vector<4x256xf32> to vector<1x256xf32>
    %175 = vector.broadcast %46 : vector<4x1xf32> to vector<4x256xf32>
    %176 = vector.broadcast %174 : vector<1x256xf32> to vector<4x256xf32>
    %177 = arith.mulf %175, %176 : vector<4x256xf32>
    %178 = arith.addf %173, %177 : vector<4x256xf32>
    %179 = vector.extract_strided_slice %1 {offsets = [2, 0], sizes = [1, 256], strides = [1, 1]} : vector<4x256xf32> to vector<1x256xf32>
    %180 = vector.broadcast %48 : vector<4x1xf32> to vector<4x256xf32>
    %181 = vector.broadcast %179 : vector<1x256xf32> to vector<4x256xf32>
    %182 = arith.mulf %180, %181 : vector<4x256xf32>
    %183 = arith.addf %178, %182 : vector<4x256xf32>
    %184 = vector.extract_strided_slice %1 {offsets = [3, 0], sizes = [1, 256], strides = [1, 1]} : vector<4x256xf32> to vector<1x256xf32>
    %185 = vector.broadcast %50 : vector<4x1xf32> to vector<4x256xf32>
    %186 = vector.broadcast %184 : vector<1x256xf32> to vector<4x256xf32>
    %187 = arith.mulf %185, %186 : vector<4x256xf32>
    %188 = arith.addf %183, %187 : vector<4x256xf32>
    %189 = arith.addf %169, %188 : vector<4x256xf32>
    %190 = vector.extract_strided_slice %88 {offsets = [0, 0], sizes = [1, 256], strides = [1, 1]} : vector<4x256xf32> to vector<1x256xf32>
    %191 = vector.broadcast %52 : vector<4x1xf32> to vector<4x256xf32>
    %192 = vector.broadcast %190 : vector<1x256xf32> to vector<4x256xf32>
    %193 = arith.mulf %191, %192 : vector<4x256xf32>
    %194 = vector.extract_strided_slice %88 {offsets = [1, 0], sizes = [1, 256], strides = [1, 1]} : vector<4x256xf32> to vector<1x256xf32>
    %195 = vector.broadcast %54 : vector<4x1xf32> to vector<4x256xf32>
    %196 = vector.broadcast %194 : vector<1x256xf32> to vector<4x256xf32>
    %197 = arith.mulf %195, %196 : vector<4x256xf32>
    %198 = arith.addf %193, %197 : vector<4x256xf32>
    %199 = vector.extract_strided_slice %88 {offsets = [2, 0], sizes = [1, 256], strides = [1, 1]} : vector<4x256xf32> to vector<1x256xf32>
    %200 = vector.broadcast %56 : vector<4x1xf32> to vector<4x256xf32>
    %201 = vector.broadcast %199 : vector<1x256xf32> to vector<4x256xf32>
    %202 = arith.mulf %200, %201 : vector<4x256xf32>
    %203 = arith.addf %198, %202 : vector<4x256xf32>
    %204 = vector.extract_strided_slice %88 {offsets = [3, 0], sizes = [1, 256], strides = [1, 1]} : vector<4x256xf32> to vector<1x256xf32>
    %205 = vector.broadcast %58 : vector<4x1xf32> to vector<4x256xf32>
    %206 = vector.broadcast %204 : vector<1x256xf32> to vector<4x256xf32>
    %207 = arith.mulf %205, %206 : vector<4x256xf32>
    %208 = arith.addf %203, %207 : vector<4x256xf32>
    %209 = arith.addf %189, %208 : vector<4x256xf32>
    %210 = arith.addf %150, %209 : vector<4x256xf32>
    %211 = vector.extract_strided_slice %85 {offsets = [0, 0], sizes = [1, 256], strides = [1, 1]} : vector<4x256xf32> to vector<1x256xf32>
    %212 = vector.broadcast %60 : vector<4x1xf32> to vector<4x256xf32>
    %213 = vector.broadcast %211 : vector<1x256xf32> to vector<4x256xf32>
    %214 = arith.mulf %212, %213 : vector<4x256xf32>
    %215 = vector.extract_strided_slice %85 {offsets = [1, 0], sizes = [1, 256], strides = [1, 1]} : vector<4x256xf32> to vector<1x256xf32>
    %216 = vector.broadcast %62 : vector<4x1xf32> to vector<4x256xf32>
    %217 = vector.broadcast %215 : vector<1x256xf32> to vector<4x256xf32>
    %218 = arith.mulf %216, %217 : vector<4x256xf32>
    %219 = arith.addf %214, %218 : vector<4x256xf32>
    %220 = vector.extract_strided_slice %85 {offsets = [2, 0], sizes = [1, 256], strides = [1, 1]} : vector<4x256xf32> to vector<1x256xf32>
    %221 = vector.broadcast %64 : vector<4x1xf32> to vector<4x256xf32>
    %222 = vector.broadcast %220 : vector<1x256xf32> to vector<4x256xf32>
    %223 = arith.mulf %221, %222 : vector<4x256xf32>
    %224 = arith.addf %219, %223 : vector<4x256xf32>
    %225 = vector.extract_strided_slice %85 {offsets = [3, 0], sizes = [1, 256], strides = [1, 1]} : vector<4x256xf32> to vector<1x256xf32>
    %226 = vector.broadcast %66 : vector<4x1xf32> to vector<4x256xf32>
    %227 = vector.broadcast %225 : vector<1x256xf32> to vector<4x256xf32>
    %228 = arith.mulf %226, %227 : vector<4x256xf32>
    %229 = arith.addf %224, %228 : vector<4x256xf32>
    %230 = vector.extract_strided_slice %1 {offsets = [0, 0], sizes = [1, 256], strides = [1, 1]} : vector<4x256xf32> to vector<1x256xf32>
    %231 = vector.broadcast %68 : vector<4x1xf32> to vector<4x256xf32>
    %232 = vector.broadcast %230 : vector<1x256xf32> to vector<4x256xf32>
    %233 = arith.mulf %231, %232 : vector<4x256xf32>
    %234 = vector.extract_strided_slice %1 {offsets = [1, 0], sizes = [1, 256], strides = [1, 1]} : vector<4x256xf32> to vector<1x256xf32>
    %235 = vector.broadcast %70 : vector<4x1xf32> to vector<4x256xf32>
    %236 = vector.broadcast %234 : vector<1x256xf32> to vector<4x256xf32>
    %237 = arith.mulf %235, %236 : vector<4x256xf32>
    %238 = arith.addf %233, %237 : vector<4x256xf32>
    %239 = vector.extract_strided_slice %1 {offsets = [2, 0], sizes = [1, 256], strides = [1, 1]} : vector<4x256xf32> to vector<1x256xf32>
    %240 = vector.broadcast %72 : vector<4x1xf32> to vector<4x256xf32>
    %241 = vector.broadcast %239 : vector<1x256xf32> to vector<4x256xf32>
    %242 = arith.mulf %240, %241 : vector<4x256xf32>
    %243 = arith.addf %238, %242 : vector<4x256xf32>
    %244 = vector.extract_strided_slice %1 {offsets = [3, 0], sizes = [1, 256], strides = [1, 1]} : vector<4x256xf32> to vector<1x256xf32>
    %245 = vector.broadcast %74 : vector<4x1xf32> to vector<4x256xf32>
    %246 = vector.broadcast %244 : vector<1x256xf32> to vector<4x256xf32>
    %247 = arith.mulf %245, %246 : vector<4x256xf32>
    %248 = arith.addf %243, %247 : vector<4x256xf32>
    %249 = arith.addf %229, %248 : vector<4x256xf32>
    %250 = vector.extract_strided_slice %88 {offsets = [0, 0], sizes = [1, 256], strides = [1, 1]} : vector<4x256xf32> to vector<1x256xf32>
    %251 = vector.broadcast %76 : vector<4x1xf32> to vector<4x256xf32>
    %252 = vector.broadcast %250 : vector<1x256xf32> to vector<4x256xf32>
    %253 = arith.mulf %251, %252 : vector<4x256xf32>
    %254 = vector.extract_strided_slice %88 {offsets = [1, 0], sizes = [1, 256], strides = [1, 1]} : vector<4x256xf32> to vector<1x256xf32>
    %255 = vector.broadcast %78 : vector<4x1xf32> to vector<4x256xf32>
    %256 = vector.broadcast %254 : vector<1x256xf32> to vector<4x256xf32>
    %257 = arith.mulf %255, %256 : vector<4x256xf32>
    %258 = arith.addf %253, %257 : vector<4x256xf32>
    %259 = vector.extract_strided_slice %88 {offsets = [2, 0], sizes = [1, 256], strides = [1, 1]} : vector<4x256xf32> to vector<1x256xf32>
    %260 = vector.broadcast %80 : vector<4x1xf32> to vector<4x256xf32>
    %261 = vector.broadcast %259 : vector<1x256xf32> to vector<4x256xf32>
    %262 = arith.mulf %260, %261 : vector<4x256xf32>
    %263 = arith.addf %258, %262 : vector<4x256xf32>
    %264 = vector.extract_strided_slice %88 {offsets = [3, 0], sizes = [1, 256], strides = [1, 1]} : vector<4x256xf32> to vector<1x256xf32>
    %265 = vector.broadcast %82 : vector<4x1xf32> to vector<4x256xf32>
    %266 = vector.broadcast %264 : vector<1x256xf32> to vector<4x256xf32>
    %267 = arith.mulf %265, %266 : vector<4x256xf32>
    %268 = arith.addf %263, %267 : vector<4x256xf32>
    %269 = arith.addf %249, %268 : vector<4x256xf32>
    %c240_i32 = arith.constant 240 : i32
    %270 = tpu.dynamic_rotate %269 by %c240_i32 dim 1 : vector<4x256xf32>, i32 -> vector<4x256xf32>
    %271 = vector.broadcast %10 : vector<1x256xf32> to vector<4x256xf32>
    %272 = arith.mulf %270, %271 : vector<4x256xf32>
    %273 = arith.addf %210, %272 : vector<4x256xf32>
    %274 = vector.broadcast %2 : vector<4x1xf32> to vector<4x256xf32>
    %275 = arith.addf %273, %274 : vector<4x256xf32>
    %cst = arith.constant 0.000000e+00 : f32
    %276 = vector.broadcast %cst : f32 to vector<4x256xf32>
    %277 = arith.maximumf %275, %276 : vector<4x256xf32>
    %278 = arith.addf %1, %277 : vector<4x256xf32>
    %c1_i32_89 = arith.constant 1 : i32
    %279 = tpu.dynamic_rotate %278 by %c1_i32_89 dim 1 : vector<4x256xf32>, i32 -> vector<4x256xf32>
    %280 = vector.broadcast %4 : vector<1x256xf32> to vector<4x256xf32>
    %281 = arith.mulf %279, %280 : vector<4x256xf32>
    %c255_i32_90 = arith.constant 255 : i32
    %282 = tpu.dynamic_rotate %278 by %c255_i32_90 dim 1 : vector<4x256xf32>, i32 -> vector<4x256xf32>
    %283 = vector.broadcast %6 : vector<1x256xf32> to vector<4x256xf32>
    %284 = arith.mulf %282, %283 : vector<4x256xf32>
    %285 = vector.extract_strided_slice %281 {offsets = [0, 0], sizes = [1, 256], strides = [1, 1]} : vector<4x256xf32> to vector<1x256xf32>
    %286 = vector.broadcast %12 : vector<4x1xf32> to vector<4x256xf32>
    %287 = vector.broadcast %285 : vector<1x256xf32> to vector<4x256xf32>
    %288 = arith.mulf %286, %287 : vector<4x256xf32>
    %289 = vector.extract_strided_slice %281 {offsets = [1, 0], sizes = [1, 256], strides = [1, 1]} : vector<4x256xf32> to vector<1x256xf32>
    %290 = vector.broadcast %14 : vector<4x1xf32> to vector<4x256xf32>
    %291 = vector.broadcast %289 : vector<1x256xf32> to vector<4x256xf32>
    %292 = arith.mulf %290, %291 : vector<4x256xf32>
    %293 = arith.addf %288, %292 : vector<4x256xf32>
    %294 = vector.extract_strided_slice %281 {offsets = [2, 0], sizes = [1, 256], strides = [1, 1]} : vector<4x256xf32> to vector<1x256xf32>
    %295 = vector.broadcast %16 : vector<4x1xf32> to vector<4x256xf32>
    %296 = vector.broadcast %294 : vector<1x256xf32> to vector<4x256xf32>
    %297 = arith.mulf %295, %296 : vector<4x256xf32>
    %298 = arith.addf %293, %297 : vector<4x256xf32>
    %299 = vector.extract_strided_slice %281 {offsets = [3, 0], sizes = [1, 256], strides = [1, 1]} : vector<4x256xf32> to vector<1x256xf32>
    %300 = vector.broadcast %18 : vector<4x1xf32> to vector<4x256xf32>
    %301 = vector.broadcast %299 : vector<1x256xf32> to vector<4x256xf32>
    %302 = arith.mulf %300, %301 : vector<4x256xf32>
    %303 = arith.addf %298, %302 : vector<4x256xf32>
    %304 = vector.extract_strided_slice %278 {offsets = [0, 0], sizes = [1, 256], strides = [1, 1]} : vector<4x256xf32> to vector<1x256xf32>
    %305 = vector.broadcast %20 : vector<4x1xf32> to vector<4x256xf32>
    %306 = vector.broadcast %304 : vector<1x256xf32> to vector<4x256xf32>
    %307 = arith.mulf %305, %306 : vector<4x256xf32>
    %308 = vector.extract_strided_slice %278 {offsets = [1, 0], sizes = [1, 256], strides = [1, 1]} : vector<4x256xf32> to vector<1x256xf32>
    %309 = vector.broadcast %22 : vector<4x1xf32> to vector<4x256xf32>
    %310 = vector.broadcast %308 : vector<1x256xf32> to vector<4x256xf32>
    %311 = arith.mulf %309, %310 : vector<4x256xf32>
    %312 = arith.addf %307, %311 : vector<4x256xf32>
    %313 = vector.extract_strided_slice %278 {offsets = [2, 0], sizes = [1, 256], strides = [1, 1]} : vector<4x256xf32> to vector<1x256xf32>
    %314 = vector.broadcast %24 : vector<4x1xf32> to vector<4x256xf32>
    %315 = vector.broadcast %313 : vector<1x256xf32> to vector<4x256xf32>
    %316 = arith.mulf %314, %315 : vector<4x256xf32>
    %317 = arith.addf %312, %316 : vector<4x256xf32>
    %318 = vector.extract_strided_slice %278 {offsets = [3, 0], sizes = [1, 256], strides = [1, 1]} : vector<4x256xf32> to vector<1x256xf32>
    %319 = vector.broadcast %26 : vector<4x1xf32> to vector<4x256xf32>
    %320 = vector.broadcast %318 : vector<1x256xf32> to vector<4x256xf32>
    %321 = arith.mulf %319, %320 : vector<4x256xf32>
    %322 = arith.addf %317, %321 : vector<4x256xf32>
    %323 = arith.addf %303, %322 : vector<4x256xf32>
    %324 = vector.extract_strided_slice %284 {offsets = [0, 0], sizes = [1, 256], strides = [1, 1]} : vector<4x256xf32> to vector<1x256xf32>
    %325 = vector.broadcast %28 : vector<4x1xf32> to vector<4x256xf32>
    %326 = vector.broadcast %324 : vector<1x256xf32> to vector<4x256xf32>
    %327 = arith.mulf %325, %326 : vector<4x256xf32>
    %328 = vector.extract_strided_slice %284 {offsets = [1, 0], sizes = [1, 256], strides = [1, 1]} : vector<4x256xf32> to vector<1x256xf32>
    %329 = vector.broadcast %30 : vector<4x1xf32> to vector<4x256xf32>
    %330 = vector.broadcast %328 : vector<1x256xf32> to vector<4x256xf32>
    %331 = arith.mulf %329, %330 : vector<4x256xf32>
    %332 = arith.addf %327, %331 : vector<4x256xf32>
    %333 = vector.extract_strided_slice %284 {offsets = [2, 0], sizes = [1, 256], strides = [1, 1]} : vector<4x256xf32> to vector<1x256xf32>
    %334 = vector.broadcast %32 : vector<4x1xf32> to vector<4x256xf32>
    %335 = vector.broadcast %333 : vector<1x256xf32> to vector<4x256xf32>
    %336 = arith.mulf %334, %335 : vector<4x256xf32>
    %337 = arith.addf %332, %336 : vector<4x256xf32>
    %338 = vector.extract_strided_slice %284 {offsets = [3, 0], sizes = [1, 256], strides = [1, 1]} : vector<4x256xf32> to vector<1x256xf32>
    %339 = vector.broadcast %34 : vector<4x1xf32> to vector<4x256xf32>
    %340 = vector.broadcast %338 : vector<1x256xf32> to vector<4x256xf32>
    %341 = arith.mulf %339, %340 : vector<4x256xf32>
    %342 = arith.addf %337, %341 : vector<4x256xf32>
    %343 = arith.addf %323, %342 : vector<4x256xf32>
    %c16_i32_91 = arith.constant 16 : i32
    %344 = tpu.dynamic_rotate %343 by %c16_i32_91 dim 1 : vector<4x256xf32>, i32 -> vector<4x256xf32>
    %345 = vector.broadcast %8 : vector<1x256xf32> to vector<4x256xf32>
    %346 = arith.mulf %344, %345 : vector<4x256xf32>
    %347 = vector.extract_strided_slice %281 {offsets = [0, 0], sizes = [1, 256], strides = [1, 1]} : vector<4x256xf32> to vector<1x256xf32>
    %348 = vector.broadcast %36 : vector<4x1xf32> to vector<4x256xf32>
    %349 = vector.broadcast %347 : vector<1x256xf32> to vector<4x256xf32>
    %350 = arith.mulf %348, %349 : vector<4x256xf32>
    %351 = vector.extract_strided_slice %281 {offsets = [1, 0], sizes = [1, 256], strides = [1, 1]} : vector<4x256xf32> to vector<1x256xf32>
    %352 = vector.broadcast %38 : vector<4x1xf32> to vector<4x256xf32>
    %353 = vector.broadcast %351 : vector<1x256xf32> to vector<4x256xf32>
    %354 = arith.mulf %352, %353 : vector<4x256xf32>
    %355 = arith.addf %350, %354 : vector<4x256xf32>
    %356 = vector.extract_strided_slice %281 {offsets = [2, 0], sizes = [1, 256], strides = [1, 1]} : vector<4x256xf32> to vector<1x256xf32>
    %357 = vector.broadcast %40 : vector<4x1xf32> to vector<4x256xf32>
    %358 = vector.broadcast %356 : vector<1x256xf32> to vector<4x256xf32>
    %359 = arith.mulf %357, %358 : vector<4x256xf32>
    %360 = arith.addf %355, %359 : vector<4x256xf32>
    %361 = vector.extract_strided_slice %281 {offsets = [3, 0], sizes = [1, 256], strides = [1, 1]} : vector<4x256xf32> to vector<1x256xf32>
    %362 = vector.broadcast %42 : vector<4x1xf32> to vector<4x256xf32>
    %363 = vector.broadcast %361 : vector<1x256xf32> to vector<4x256xf32>
    %364 = arith.mulf %362, %363 : vector<4x256xf32>
    %365 = arith.addf %360, %364 : vector<4x256xf32>
    %366 = vector.extract_strided_slice %278 {offsets = [0, 0], sizes = [1, 256], strides = [1, 1]} : vector<4x256xf32> to vector<1x256xf32>
    %367 = vector.broadcast %44 : vector<4x1xf32> to vector<4x256xf32>
    %368 = vector.broadcast %366 : vector<1x256xf32> to vector<4x256xf32>
    %369 = arith.mulf %367, %368 : vector<4x256xf32>
    %370 = vector.extract_strided_slice %278 {offsets = [1, 0], sizes = [1, 256], strides = [1, 1]} : vector<4x256xf32> to vector<1x256xf32>
    %371 = vector.broadcast %46 : vector<4x1xf32> to vector<4x256xf32>
    %372 = vector.broadcast %370 : vector<1x256xf32> to vector<4x256xf32>
    %373 = arith.mulf %371, %372 : vector<4x256xf32>
    %374 = arith.addf %369, %373 : vector<4x256xf32>
    %375 = vector.extract_strided_slice %278 {offsets = [2, 0], sizes = [1, 256], strides = [1, 1]} : vector<4x256xf32> to vector<1x256xf32>
    %376 = vector.broadcast %48 : vector<4x1xf32> to vector<4x256xf32>
    %377 = vector.broadcast %375 : vector<1x256xf32> to vector<4x256xf32>
    %378 = arith.mulf %376, %377 : vector<4x256xf32>
    %379 = arith.addf %374, %378 : vector<4x256xf32>
    %380 = vector.extract_strided_slice %278 {offsets = [3, 0], sizes = [1, 256], strides = [1, 1]} : vector<4x256xf32> to vector<1x256xf32>
    %381 = vector.broadcast %50 : vector<4x1xf32> to vector<4x256xf32>
    %382 = vector.broadcast %380 : vector<1x256xf32> to vector<4x256xf32>
    %383 = arith.mulf %381, %382 : vector<4x256xf32>
    %384 = arith.addf %379, %383 : vector<4x256xf32>
    %385 = arith.addf %365, %384 : vector<4x256xf32>
    %386 = vector.extract_strided_slice %284 {offsets = [0, 0], sizes = [1, 256], strides = [1, 1]} : vector<4x256xf32> to vector<1x256xf32>
    %387 = vector.broadcast %52 : vector<4x1xf32> to vector<4x256xf32>
    %388 = vector.broadcast %386 : vector<1x256xf32> to vector<4x256xf32>
    %389 = arith.mulf %387, %388 : vector<4x256xf32>
    %390 = vector.extract_strided_slice %284 {offsets = [1, 0], sizes = [1, 256], strides = [1, 1]} : vector<4x256xf32> to vector<1x256xf32>
    %391 = vector.broadcast %54 : vector<4x1xf32> to vector<4x256xf32>
    %392 = vector.broadcast %390 : vector<1x256xf32> to vector<4x256xf32>
    %393 = arith.mulf %391, %392 : vector<4x256xf32>
    %394 = arith.addf %389, %393 : vector<4x256xf32>
    %395 = vector.extract_strided_slice %284 {offsets = [2, 0], sizes = [1, 256], strides = [1, 1]} : vector<4x256xf32> to vector<1x256xf32>
    %396 = vector.broadcast %56 : vector<4x1xf32> to vector<4x256xf32>
    %397 = vector.broadcast %395 : vector<1x256xf32> to vector<4x256xf32>
    %398 = arith.mulf %396, %397 : vector<4x256xf32>
    %399 = arith.addf %394, %398 : vector<4x256xf32>
    %400 = vector.extract_strided_slice %284 {offsets = [3, 0], sizes = [1, 256], strides = [1, 1]} : vector<4x256xf32> to vector<1x256xf32>
    %401 = vector.broadcast %58 : vector<4x1xf32> to vector<4x256xf32>
    %402 = vector.broadcast %400 : vector<1x256xf32> to vector<4x256xf32>
    %403 = arith.mulf %401, %402 : vector<4x256xf32>
    %404 = arith.addf %399, %403 : vector<4x256xf32>
    %405 = arith.addf %385, %404 : vector<4x256xf32>
    %406 = arith.addf %346, %405 : vector<4x256xf32>
    %407 = vector.extract_strided_slice %281 {offsets = [0, 0], sizes = [1, 256], strides = [1, 1]} : vector<4x256xf32> to vector<1x256xf32>
    %408 = vector.broadcast %60 : vector<4x1xf32> to vector<4x256xf32>
    %409 = vector.broadcast %407 : vector<1x256xf32> to vector<4x256xf32>
    %410 = arith.mulf %408, %409 : vector<4x256xf32>
    %411 = vector.extract_strided_slice %281 {offsets = [1, 0], sizes = [1, 256], strides = [1, 1]} : vector<4x256xf32> to vector<1x256xf32>
    %412 = vector.broadcast %62 : vector<4x1xf32> to vector<4x256xf32>
    %413 = vector.broadcast %411 : vector<1x256xf32> to vector<4x256xf32>
    %414 = arith.mulf %412, %413 : vector<4x256xf32>
    %415 = arith.addf %410, %414 : vector<4x256xf32>
    %416 = vector.extract_strided_slice %281 {offsets = [2, 0], sizes = [1, 256], strides = [1, 1]} : vector<4x256xf32> to vector<1x256xf32>
    %417 = vector.broadcast %64 : vector<4x1xf32> to vector<4x256xf32>
    %418 = vector.broadcast %416 : vector<1x256xf32> to vector<4x256xf32>
    %419 = arith.mulf %417, %418 : vector<4x256xf32>
    %420 = arith.addf %415, %419 : vector<4x256xf32>
    %421 = vector.extract_strided_slice %281 {offsets = [3, 0], sizes = [1, 256], strides = [1, 1]} : vector<4x256xf32> to vector<1x256xf32>
    %422 = vector.broadcast %66 : vector<4x1xf32> to vector<4x256xf32>
    %423 = vector.broadcast %421 : vector<1x256xf32> to vector<4x256xf32>
    %424 = arith.mulf %422, %423 : vector<4x256xf32>
    %425 = arith.addf %420, %424 : vector<4x256xf32>
    %426 = vector.extract_strided_slice %278 {offsets = [0, 0], sizes = [1, 256], strides = [1, 1]} : vector<4x256xf32> to vector<1x256xf32>
    %427 = vector.broadcast %68 : vector<4x1xf32> to vector<4x256xf32>
    %428 = vector.broadcast %426 : vector<1x256xf32> to vector<4x256xf32>
    %429 = arith.mulf %427, %428 : vector<4x256xf32>
    %430 = vector.extract_strided_slice %278 {offsets = [1, 0], sizes = [1, 256], strides = [1, 1]} : vector<4x256xf32> to vector<1x256xf32>
    %431 = vector.broadcast %70 : vector<4x1xf32> to vector<4x256xf32>
    %432 = vector.broadcast %430 : vector<1x256xf32> to vector<4x256xf32>
    %433 = arith.mulf %431, %432 : vector<4x256xf32>
    %434 = arith.addf %429, %433 : vector<4x256xf32>
    %435 = vector.extract_strided_slice %278 {offsets = [2, 0], sizes = [1, 256], strides = [1, 1]} : vector<4x256xf32> to vector<1x256xf32>
    %436 = vector.broadcast %72 : vector<4x1xf32> to vector<4x256xf32>
    %437 = vector.broadcast %435 : vector<1x256xf32> to vector<4x256xf32>
    %438 = arith.mulf %436, %437 : vector<4x256xf32>
    %439 = arith.addf %434, %438 : vector<4x256xf32>
    %440 = vector.extract_strided_slice %278 {offsets = [3, 0], sizes = [1, 256], strides = [1, 1]} : vector<4x256xf32> to vector<1x256xf32>
    %441 = vector.broadcast %74 : vector<4x1xf32> to vector<4x256xf32>
    %442 = vector.broadcast %440 : vector<1x256xf32> to vector<4x256xf32>
    %443 = arith.mulf %441, %442 : vector<4x256xf32>
    %444 = arith.addf %439, %443 : vector<4x256xf32>
    %445 = arith.addf %425, %444 : vector<4x256xf32>
    %446 = vector.extract_strided_slice %284 {offsets = [0, 0], sizes = [1, 256], strides = [1, 1]} : vector<4x256xf32> to vector<1x256xf32>
    %447 = vector.broadcast %76 : vector<4x1xf32> to vector<4x256xf32>
    %448 = vector.broadcast %446 : vector<1x256xf32> to vector<4x256xf32>
    %449 = arith.mulf %447, %448 : vector<4x256xf32>
    %450 = vector.extract_strided_slice %284 {offsets = [1, 0], sizes = [1, 256], strides = [1, 1]} : vector<4x256xf32> to vector<1x256xf32>
    %451 = vector.broadcast %78 : vector<4x1xf32> to vector<4x256xf32>
    %452 = vector.broadcast %450 : vector<1x256xf32> to vector<4x256xf32>
    %453 = arith.mulf %451, %452 : vector<4x256xf32>
    %454 = arith.addf %449, %453 : vector<4x256xf32>
    %455 = vector.extract_strided_slice %284 {offsets = [2, 0], sizes = [1, 256], strides = [1, 1]} : vector<4x256xf32> to vector<1x256xf32>
    %456 = vector.broadcast %80 : vector<4x1xf32> to vector<4x256xf32>
    %457 = vector.broadcast %455 : vector<1x256xf32> to vector<4x256xf32>
    %458 = arith.mulf %456, %457 : vector<4x256xf32>
    %459 = arith.addf %454, %458 : vector<4x256xf32>
    %460 = vector.extract_strided_slice %284 {offsets = [3, 0], sizes = [1, 256], strides = [1, 1]} : vector<4x256xf32> to vector<1x256xf32>
    %461 = vector.broadcast %82 : vector<4x1xf32> to vector<4x256xf32>
    %462 = vector.broadcast %460 : vector<1x256xf32> to vector<4x256xf32>
    %463 = arith.mulf %461, %462 : vector<4x256xf32>
    %464 = arith.addf %459, %463 : vector<4x256xf32>
    %465 = arith.addf %445, %464 : vector<4x256xf32>
    %c240_i32_92 = arith.constant 240 : i32
    %466 = tpu.dynamic_rotate %465 by %c240_i32_92 dim 1 : vector<4x256xf32>, i32 -> vector<4x256xf32>
    %467 = vector.broadcast %10 : vector<1x256xf32> to vector<4x256xf32>
    %468 = arith.mulf %466, %467 : vector<4x256xf32>
    %469 = arith.addf %406, %468 : vector<4x256xf32>
    %470 = vector.broadcast %2 : vector<4x1xf32> to vector<4x256xf32>
    %471 = arith.addf %469, %470 : vector<4x256xf32>
    %cst_93 = arith.constant 0.000000e+00 : f32
    %472 = vector.broadcast %cst_93 : f32 to vector<4x256xf32>
    %473 = arith.maximumf %471, %472 : vector<4x256xf32>
    %474 = arith.addf %1, %473 : vector<4x256xf32>
    %c1_i32_94 = arith.constant 1 : i32
    %475 = tpu.dynamic_rotate %474 by %c1_i32_94 dim 1 : vector<4x256xf32>, i32 -> vector<4x256xf32>
    %476 = vector.broadcast %4 : vector<1x256xf32> to vector<4x256xf32>
    %477 = arith.mulf %475, %476 : vector<4x256xf32>
    %c255_i32_95 = arith.constant 255 : i32
    %478 = tpu.dynamic_rotate %474 by %c255_i32_95 dim 1 : vector<4x256xf32>, i32 -> vector<4x256xf32>
    %479 = vector.broadcast %6 : vector<1x256xf32> to vector<4x256xf32>
    %480 = arith.mulf %478, %479 : vector<4x256xf32>
    %481 = vector.extract_strided_slice %477 {offsets = [0, 0], sizes = [1, 256], strides = [1, 1]} : vector<4x256xf32> to vector<1x256xf32>
    %482 = vector.broadcast %12 : vector<4x1xf32> to vector<4x256xf32>
    %483 = vector.broadcast %481 : vector<1x256xf32> to vector<4x256xf32>
    %484 = arith.mulf %482, %483 : vector<4x256xf32>
    %485 = vector.extract_strided_slice %477 {offsets = [1, 0], sizes = [1, 256], strides = [1, 1]} : vector<4x256xf32> to vector<1x256xf32>
    %486 = vector.broadcast %14 : vector<4x1xf32> to vector<4x256xf32>
    %487 = vector.broadcast %485 : vector<1x256xf32> to vector<4x256xf32>
    %488 = arith.mulf %486, %487 : vector<4x256xf32>
    %489 = arith.addf %484, %488 : vector<4x256xf32>
    %490 = vector.extract_strided_slice %477 {offsets = [2, 0], sizes = [1, 256], strides = [1, 1]} : vector<4x256xf32> to vector<1x256xf32>
    %491 = vector.broadcast %16 : vector<4x1xf32> to vector<4x256xf32>
    %492 = vector.broadcast %490 : vector<1x256xf32> to vector<4x256xf32>
    %493 = arith.mulf %491, %492 : vector<4x256xf32>
    %494 = arith.addf %489, %493 : vector<4x256xf32>
    %495 = vector.extract_strided_slice %477 {offsets = [3, 0], sizes = [1, 256], strides = [1, 1]} : vector<4x256xf32> to vector<1x256xf32>
    %496 = vector.broadcast %18 : vector<4x1xf32> to vector<4x256xf32>
    %497 = vector.broadcast %495 : vector<1x256xf32> to vector<4x256xf32>
    %498 = arith.mulf %496, %497 : vector<4x256xf32>
    %499 = arith.addf %494, %498 : vector<4x256xf32>
    %500 = vector.extract_strided_slice %474 {offsets = [0, 0], sizes = [1, 256], strides = [1, 1]} : vector<4x256xf32> to vector<1x256xf32>
    %501 = vector.broadcast %20 : vector<4x1xf32> to vector<4x256xf32>
    %502 = vector.broadcast %500 : vector<1x256xf32> to vector<4x256xf32>
    %503 = arith.mulf %501, %502 : vector<4x256xf32>
    %504 = vector.extract_strided_slice %474 {offsets = [1, 0], sizes = [1, 256], strides = [1, 1]} : vector<4x256xf32> to vector<1x256xf32>
    %505 = vector.broadcast %22 : vector<4x1xf32> to vector<4x256xf32>
    %506 = vector.broadcast %504 : vector<1x256xf32> to vector<4x256xf32>
    %507 = arith.mulf %505, %506 : vector<4x256xf32>
    %508 = arith.addf %503, %507 : vector<4x256xf32>
    %509 = vector.extract_strided_slice %474 {offsets = [2, 0], sizes = [1, 256], strides = [1, 1]} : vector<4x256xf32> to vector<1x256xf32>
    %510 = vector.broadcast %24 : vector<4x1xf32> to vector<4x256xf32>
    %511 = vector.broadcast %509 : vector<1x256xf32> to vector<4x256xf32>
    %512 = arith.mulf %510, %511 : vector<4x256xf32>
    %513 = arith.addf %508, %512 : vector<4x256xf32>
    %514 = vector.extract_strided_slice %474 {offsets = [3, 0], sizes = [1, 256], strides = [1, 1]} : vector<4x256xf32> to vector<1x256xf32>
    %515 = vector.broadcast %26 : vector<4x1xf32> to vector<4x256xf32>
    %516 = vector.broadcast %514 : vector<1x256xf32> to vector<4x256xf32>
    %517 = arith.mulf %515, %516 : vector<4x256xf32>
    %518 = arith.addf %513, %517 : vector<4x256xf32>
    %519 = arith.addf %499, %518 : vector<4x256xf32>
    %520 = vector.extract_strided_slice %480 {offsets = [0, 0], sizes = [1, 256], strides = [1, 1]} : vector<4x256xf32> to vector<1x256xf32>
    %521 = vector.broadcast %28 : vector<4x1xf32> to vector<4x256xf32>
    %522 = vector.broadcast %520 : vector<1x256xf32> to vector<4x256xf32>
    %523 = arith.mulf %521, %522 : vector<4x256xf32>
    %524 = vector.extract_strided_slice %480 {offsets = [1, 0], sizes = [1, 256], strides = [1, 1]} : vector<4x256xf32> to vector<1x256xf32>
    %525 = vector.broadcast %30 : vector<4x1xf32> to vector<4x256xf32>
    %526 = vector.broadcast %524 : vector<1x256xf32> to vector<4x256xf32>
    %527 = arith.mulf %525, %526 : vector<4x256xf32>
    %528 = arith.addf %523, %527 : vector<4x256xf32>
    %529 = vector.extract_strided_slice %480 {offsets = [2, 0], sizes = [1, 256], strides = [1, 1]} : vector<4x256xf32> to vector<1x256xf32>
    %530 = vector.broadcast %32 : vector<4x1xf32> to vector<4x256xf32>
    %531 = vector.broadcast %529 : vector<1x256xf32> to vector<4x256xf32>
    %532 = arith.mulf %530, %531 : vector<4x256xf32>
    %533 = arith.addf %528, %532 : vector<4x256xf32>
    %534 = vector.extract_strided_slice %480 {offsets = [3, 0], sizes = [1, 256], strides = [1, 1]} : vector<4x256xf32> to vector<1x256xf32>
    %535 = vector.broadcast %34 : vector<4x1xf32> to vector<4x256xf32>
    %536 = vector.broadcast %534 : vector<1x256xf32> to vector<4x256xf32>
    %537 = arith.mulf %535, %536 : vector<4x256xf32>
    %538 = arith.addf %533, %537 : vector<4x256xf32>
    %539 = arith.addf %519, %538 : vector<4x256xf32>
    %c16_i32_96 = arith.constant 16 : i32
    %540 = tpu.dynamic_rotate %539 by %c16_i32_96 dim 1 : vector<4x256xf32>, i32 -> vector<4x256xf32>
    %541 = vector.broadcast %8 : vector<1x256xf32> to vector<4x256xf32>
    %542 = arith.mulf %540, %541 : vector<4x256xf32>
    %543 = vector.extract_strided_slice %477 {offsets = [0, 0], sizes = [1, 256], strides = [1, 1]} : vector<4x256xf32> to vector<1x256xf32>
    %544 = vector.broadcast %36 : vector<4x1xf32> to vector<4x256xf32>
    %545 = vector.broadcast %543 : vector<1x256xf32> to vector<4x256xf32>
    %546 = arith.mulf %544, %545 : vector<4x256xf32>
    %547 = vector.extract_strided_slice %477 {offsets = [1, 0], sizes = [1, 256], strides = [1, 1]} : vector<4x256xf32> to vector<1x256xf32>
    %548 = vector.broadcast %38 : vector<4x1xf32> to vector<4x256xf32>
    %549 = vector.broadcast %547 : vector<1x256xf32> to vector<4x256xf32>
    %550 = arith.mulf %548, %549 : vector<4x256xf32>
    %551 = arith.addf %546, %550 : vector<4x256xf32>
    %552 = vector.extract_strided_slice %477 {offsets = [2, 0], sizes = [1, 256], strides = [1, 1]} : vector<4x256xf32> to vector<1x256xf32>
    %553 = vector.broadcast %40 : vector<4x1xf32> to vector<4x256xf32>
    %554 = vector.broadcast %552 : vector<1x256xf32> to vector<4x256xf32>
    %555 = arith.mulf %553, %554 : vector<4x256xf32>
    %556 = arith.addf %551, %555 : vector<4x256xf32>
    %557 = vector.extract_strided_slice %477 {offsets = [3, 0], sizes = [1, 256], strides = [1, 1]} : vector<4x256xf32> to vector<1x256xf32>
    %558 = vector.broadcast %42 : vector<4x1xf32> to vector<4x256xf32>
    %559 = vector.broadcast %557 : vector<1x256xf32> to vector<4x256xf32>
    %560 = arith.mulf %558, %559 : vector<4x256xf32>
    %561 = arith.addf %556, %560 : vector<4x256xf32>
    %562 = vector.extract_strided_slice %474 {offsets = [0, 0], sizes = [1, 256], strides = [1, 1]} : vector<4x256xf32> to vector<1x256xf32>
    %563 = vector.broadcast %44 : vector<4x1xf32> to vector<4x256xf32>
    %564 = vector.broadcast %562 : vector<1x256xf32> to vector<4x256xf32>
    %565 = arith.mulf %563, %564 : vector<4x256xf32>
    %566 = vector.extract_strided_slice %474 {offsets = [1, 0], sizes = [1, 256], strides = [1, 1]} : vector<4x256xf32> to vector<1x256xf32>
    %567 = vector.broadcast %46 : vector<4x1xf32> to vector<4x256xf32>
    %568 = vector.broadcast %566 : vector<1x256xf32> to vector<4x256xf32>
    %569 = arith.mulf %567, %568 : vector<4x256xf32>
    %570 = arith.addf %565, %569 : vector<4x256xf32>
    %571 = vector.extract_strided_slice %474 {offsets = [2, 0], sizes = [1, 256], strides = [1, 1]} : vector<4x256xf32> to vector<1x256xf32>
    %572 = vector.broadcast %48 : vector<4x1xf32> to vector<4x256xf32>
    %573 = vector.broadcast %571 : vector<1x256xf32> to vector<4x256xf32>
    %574 = arith.mulf %572, %573 : vector<4x256xf32>
    %575 = arith.addf %570, %574 : vector<4x256xf32>
    %576 = vector.extract_strided_slice %474 {offsets = [3, 0], sizes = [1, 256], strides = [1, 1]} : vector<4x256xf32> to vector<1x256xf32>
    %577 = vector.broadcast %50 : vector<4x1xf32> to vector<4x256xf32>
    %578 = vector.broadcast %576 : vector<1x256xf32> to vector<4x256xf32>
    %579 = arith.mulf %577, %578 : vector<4x256xf32>
    %580 = arith.addf %575, %579 : vector<4x256xf32>
    %581 = arith.addf %561, %580 : vector<4x256xf32>
    %582 = vector.extract_strided_slice %480 {offsets = [0, 0], sizes = [1, 256], strides = [1, 1]} : vector<4x256xf32> to vector<1x256xf32>
    %583 = vector.broadcast %52 : vector<4x1xf32> to vector<4x256xf32>
    %584 = vector.broadcast %582 : vector<1x256xf32> to vector<4x256xf32>
    %585 = arith.mulf %583, %584 : vector<4x256xf32>
    %586 = vector.extract_strided_slice %480 {offsets = [1, 0], sizes = [1, 256], strides = [1, 1]} : vector<4x256xf32> to vector<1x256xf32>
    %587 = vector.broadcast %54 : vector<4x1xf32> to vector<4x256xf32>
    %588 = vector.broadcast %586 : vector<1x256xf32> to vector<4x256xf32>
    %589 = arith.mulf %587, %588 : vector<4x256xf32>
    %590 = arith.addf %585, %589 : vector<4x256xf32>
    %591 = vector.extract_strided_slice %480 {offsets = [2, 0], sizes = [1, 256], strides = [1, 1]} : vector<4x256xf32> to vector<1x256xf32>
    %592 = vector.broadcast %56 : vector<4x1xf32> to vector<4x256xf32>
    %593 = vector.broadcast %591 : vector<1x256xf32> to vector<4x256xf32>
    %594 = arith.mulf %592, %593 : vector<4x256xf32>
    %595 = arith.addf %590, %594 : vector<4x256xf32>
    %596 = vector.extract_strided_slice %480 {offsets = [3, 0], sizes = [1, 256], strides = [1, 1]} : vector<4x256xf32> to vector<1x256xf32>
    %597 = vector.broadcast %58 : vector<4x1xf32> to vector<4x256xf32>
    %598 = vector.broadcast %596 : vector<1x256xf32> to vector<4x256xf32>
    %599 = arith.mulf %597, %598 : vector<4x256xf32>
    %600 = arith.addf %595, %599 : vector<4x256xf32>
    %601 = arith.addf %581, %600 : vector<4x256xf32>
    %602 = arith.addf %542, %601 : vector<4x256xf32>
    %603 = vector.extract_strided_slice %477 {offsets = [0, 0], sizes = [1, 256], strides = [1, 1]} : vector<4x256xf32> to vector<1x256xf32>
    %604 = vector.broadcast %60 : vector<4x1xf32> to vector<4x256xf32>
    %605 = vector.broadcast %603 : vector<1x256xf32> to vector<4x256xf32>
    %606 = arith.mulf %604, %605 : vector<4x256xf32>
    %607 = vector.extract_strided_slice %477 {offsets = [1, 0], sizes = [1, 256], strides = [1, 1]} : vector<4x256xf32> to vector<1x256xf32>
    %608 = vector.broadcast %62 : vector<4x1xf32> to vector<4x256xf32>
    %609 = vector.broadcast %607 : vector<1x256xf32> to vector<4x256xf32>
    %610 = arith.mulf %608, %609 : vector<4x256xf32>
    %611 = arith.addf %606, %610 : vector<4x256xf32>
    %612 = vector.extract_strided_slice %477 {offsets = [2, 0], sizes = [1, 256], strides = [1, 1]} : vector<4x256xf32> to vector<1x256xf32>
    %613 = vector.broadcast %64 : vector<4x1xf32> to vector<4x256xf32>
    %614 = vector.broadcast %612 : vector<1x256xf32> to vector<4x256xf32>
    %615 = arith.mulf %613, %614 : vector<4x256xf32>
    %616 = arith.addf %611, %615 : vector<4x256xf32>
    %617 = vector.extract_strided_slice %477 {offsets = [3, 0], sizes = [1, 256], strides = [1, 1]} : vector<4x256xf32> to vector<1x256xf32>
    %618 = vector.broadcast %66 : vector<4x1xf32> to vector<4x256xf32>
    %619 = vector.broadcast %617 : vector<1x256xf32> to vector<4x256xf32>
    %620 = arith.mulf %618, %619 : vector<4x256xf32>
    %621 = arith.addf %616, %620 : vector<4x256xf32>
    %622 = vector.extract_strided_slice %474 {offsets = [0, 0], sizes = [1, 256], strides = [1, 1]} : vector<4x256xf32> to vector<1x256xf32>
    %623 = vector.broadcast %68 : vector<4x1xf32> to vector<4x256xf32>
    %624 = vector.broadcast %622 : vector<1x256xf32> to vector<4x256xf32>
    %625 = arith.mulf %623, %624 : vector<4x256xf32>
    %626 = vector.extract_strided_slice %474 {offsets = [1, 0], sizes = [1, 256], strides = [1, 1]} : vector<4x256xf32> to vector<1x256xf32>
    %627 = vector.broadcast %70 : vector<4x1xf32> to vector<4x256xf32>
    %628 = vector.broadcast %626 : vector<1x256xf32> to vector<4x256xf32>
    %629 = arith.mulf %627, %628 : vector<4x256xf32>
    %630 = arith.addf %625, %629 : vector<4x256xf32>
    %631 = vector.extract_strided_slice %474 {offsets = [2, 0], sizes = [1, 256], strides = [1, 1]} : vector<4x256xf32> to vector<1x256xf32>
    %632 = vector.broadcast %72 : vector<4x1xf32> to vector<4x256xf32>
    %633 = vector.broadcast %631 : vector<1x256xf32> to vector<4x256xf32>
    %634 = arith.mulf %632, %633 : vector<4x256xf32>
    %635 = arith.addf %630, %634 : vector<4x256xf32>
    %636 = vector.extract_strided_slice %474 {offsets = [3, 0], sizes = [1, 256], strides = [1, 1]} : vector<4x256xf32> to vector<1x256xf32>
    %637 = vector.broadcast %74 : vector<4x1xf32> to vector<4x256xf32>
    %638 = vector.broadcast %636 : vector<1x256xf32> to vector<4x256xf32>
    %639 = arith.mulf %637, %638 : vector<4x256xf32>
    %640 = arith.addf %635, %639 : vector<4x256xf32>
    %641 = arith.addf %621, %640 : vector<4x256xf32>
    %642 = vector.extract_strided_slice %480 {offsets = [0, 0], sizes = [1, 256], strides = [1, 1]} : vector<4x256xf32> to vector<1x256xf32>
    %643 = vector.broadcast %76 : vector<4x1xf32> to vector<4x256xf32>
    %644 = vector.broadcast %642 : vector<1x256xf32> to vector<4x256xf32>
    %645 = arith.mulf %643, %644 : vector<4x256xf32>
    %646 = vector.extract_strided_slice %480 {offsets = [1, 0], sizes = [1, 256], strides = [1, 1]} : vector<4x256xf32> to vector<1x256xf32>
    %647 = vector.broadcast %78 : vector<4x1xf32> to vector<4x256xf32>
    %648 = vector.broadcast %646 : vector<1x256xf32> to vector<4x256xf32>
    %649 = arith.mulf %647, %648 : vector<4x256xf32>
    %650 = arith.addf %645, %649 : vector<4x256xf32>
    %651 = vector.extract_strided_slice %480 {offsets = [2, 0], sizes = [1, 256], strides = [1, 1]} : vector<4x256xf32> to vector<1x256xf32>
    %652 = vector.broadcast %80 : vector<4x1xf32> to vector<4x256xf32>
    %653 = vector.broadcast %651 : vector<1x256xf32> to vector<4x256xf32>
    %654 = arith.mulf %652, %653 : vector<4x256xf32>
    %655 = arith.addf %650, %654 : vector<4x256xf32>
    %656 = vector.extract_strided_slice %480 {offsets = [3, 0], sizes = [1, 256], strides = [1, 1]} : vector<4x256xf32> to vector<1x256xf32>
    %657 = vector.broadcast %82 : vector<4x1xf32> to vector<4x256xf32>
    %658 = vector.broadcast %656 : vector<1x256xf32> to vector<4x256xf32>
    %659 = arith.mulf %657, %658 : vector<4x256xf32>
    %660 = arith.addf %655, %659 : vector<4x256xf32>
    %661 = arith.addf %641, %660 : vector<4x256xf32>
    %c240_i32_97 = arith.constant 240 : i32
    %662 = tpu.dynamic_rotate %661 by %c240_i32_97 dim 1 : vector<4x256xf32>, i32 -> vector<4x256xf32>
    %663 = vector.broadcast %10 : vector<1x256xf32> to vector<4x256xf32>
    %664 = arith.mulf %662, %663 : vector<4x256xf32>
    %665 = arith.addf %602, %664 : vector<4x256xf32>
    %666 = vector.broadcast %2 : vector<4x1xf32> to vector<4x256xf32>
    %667 = arith.addf %665, %666 : vector<4x256xf32>
    %cst_98 = arith.constant 0.000000e+00 : f32
    %668 = vector.broadcast %cst_98 : f32 to vector<4x256xf32>
    %669 = arith.maximumf %667, %668 : vector<4x256xf32>
    %c0_99 = arith.constant 0 : index
    %c0_100 = arith.constant 0 : index
    %c0_101 = arith.constant 0 : index
    %670 = vector.load %arg5[%c0_99, %c0_100, %c0_101] : memref<1x4x256xf32, #tpu.memory_space<vmem>>, vector<1x4x256xf32>
    %671 = vector.shape_cast %670 : vector<1x4x256xf32> to vector<4x256xf32>
    %672 = vector.shape_cast %669 : vector<4x256xf32> to vector<1x4x256xf32>
    tpu.vector_store %arg5[%c0_99, %c0_100, %c0_101], %672 {strides = array<i32>} : memref<1x4x256xf32, #tpu.memory_space<vmem>>, vector<1x4x256xf32>,
    return
  }
  func.func @transform_0(%arg0: i32) -> (i32, i32, i32) {
    %c0_i32 = arith.constant 0 : i32
    %c0_i32_0 = arith.constant 0 : i32
    %c0_i32_1 = arith.constant 0 : i32
    return %arg0, %c0_i32, %c0_i32_0 : i32, i32, i32
  }
  func.func @transform_1(%arg0: i32) -> (i32, i32, i32) {
    %c0_i32 = arith.constant 0 : i32
    %c0_i32_0 = arith.constant 0 : i32
    %c0_i32_1 = arith.constant 0 : i32
    %c0_i32_2 = arith.constant 0 : i32
    return %c0_i32, %c0_i32_0, %c0_i32_1 : i32, i32, i32
  }
  func.func @transform_2(%arg0: i32) -> (i32, i32, i32) {
    %c0_i32 = arith.constant 0 : i32
    %c0_i32_0 = arith.constant 0 : i32
    %c0_i32_1 = arith.constant 0 : i32
    %c0_i32_2 = arith.constant 0 : i32
    return %c0_i32, %c0_i32_0, %c0_i32_1 : i32, i32, i32
  }
  func.func @transform_3(%arg0: i32) -> (i32, i32) {
    %c0_i32 = arith.constant 0 : i32
    %c0_i32_0 = arith.constant 0 : i32
    %c0_i32_1 = arith.constant 0 : i32
    return %c0_i32, %c0_i32_0 : i32, i32
  }
  func.func @transform_4(%arg0: i32) -> (i32, i32, i32) {
    %c0_i32 = arith.constant 0 : i32
    %c0_i32_0 = arith.constant 0 : i32
    %c0_i32_1 = arith.constant 0 : i32
    return %arg0, %c0_i32, %c0_i32_0 : i32, i32, i32
  }
}

</mosaic_0001>

<bundles_post_ra>
// kernel: recurrent_block_r2u.1
= control target key start
LH: loop header
LB: loop body
LE: loop exit
PB: predicated region body
PF: predicated region fallthrough
CT: control target
= control target key end

     0   :  { %s1640_s15 = smov 0   ;;  %s2648_s0 = inlined_call_operand.vmem [shape: f32[2,4,256], index: 0, kind: input, shape index: {}]   ;;  %s2649_s1 = inlined_call_operand.vmem [shape: f32[4,1,256], index: 1, kind: input, shape index: {}]   ;;  %s2650_s2 = inlined_call_operand.vmem [shape: f32[36,4,1], index: 2, kind: input, shape index: {}]   ;;  %s2651_s3 = inlined_call_operand.vmem [shape: f32[4,1], index: 3, kind: input, shape index: {}]   ;;  %s2652_s4 = inlined_call_operand.vmem [shape: f32[2,4,256], index: 4, kind: output, shape index: {}]  }
   0x1 LB: > { %s1534_s16 = sadd.s32 4294967295, %s1608_s15   ;;  %p1538_p0 = scmp.ge.s32.totalorder %s1608_s15, 1  ;;  %s1608_s15 = sphi %s1640_s15, %s14_s15  }
   0x2   : > { %p162_p1 = scmp.lt.s32.totalorder %s1608_s15, 3 }
   0x4   : > { %p163_p2 = pnand %p1538_p0, %p162_p1 }
   0x6   : > { %166 = sbr.rel (%p163_p2) target bundleno = 883 (0x373), region = 36 }
   0xd   : > { %v1549_v0 = vld [vmem:[%s2650_s2 + $0x10] sm:$0xf]  ;;  %v207_v1 = vld [vmem:[%s2650_s2] sm:$0xf]  ;;  %p188_p3 = scmp.lt.s32.totalorder %s1534_s16, 1  ;;  %v1610_v2 = vmov 0   ;;  %v285_v44 = vlaneseq }
   0xe   : > { %1599 = vset.pattern.permute.xlu1 %v1610_v2  ;;  %1598 = vset.pattern.permute.xlu0 %v1610_v2  ;;  %v1550_v3 = vld [vmem:[%s2650_s2 + $0x14] sm:$0xf]  ;;  %v1546_v4 = vld [vmem:[%s2650_s2 + $0x4] sm:$0xf]  ;;  %s1611_s29 = smov 1   ;;  %s1612_s22 = smov 127  }
   0xf   : > { %391 = vperm.xlu1 %1599, %v1549_v0   ;;  %325 = vperm.xlu0 %1598, %v207_v1   ;;  %s2883_s16 = smov (!%p188_p3, %s1534_s16), 1  ;;  %v1547_v7 = vld [vmem:[%s2650_s2 + $0x8] sm:$0xf]  ;;  %v1551_v8 = vld [vmem:[%s2650_s2 + $0x18] sm:$0xf]  ;;  %v292_v47 = vshrl.u32 %v285_v44, 7 }
  0x10   : > { %s1583_s25 = sshll.u32 %s2883_s16, 3  ;;  %v1553_v9 = vld [vmem:[%s2650_s2 + $0x20] sm:$0xf]  ;;  %v1554_v10 = vld [vmem:[%s2650_s2 + $0x24] sm:$0xf]  ;;  %v1788_v48 = vand.u32 127, %v285_v44 }
  0x11   : > { %s1668_s28 = scalar_lea.vmem %s2648_s0, %s1583_s25  ;;  %v1569_v11 = vld [vmem:[%s2650_s2 + $0x60] sm:$0xf]  ;;  %v1570_v12 = vld [vmem:[%s2650_s2 + $0x64] sm:$0xf]  ;;  %v1573_v13 = vld [vmem:[%s2650_s2 + $0x70] sm:$0xf] }
  0x12   : > { %v1671_v5 = vld [vmem:[%s1668_s28] sm:$0xff]  ;;  %v1574_v14 = vld [vmem:[%s2650_s2 + $0x74] sm:$0xf]  ;;  %v1548_v15 = vld [vmem:[%s2650_s2 + $0xc] sm:$0xf]  ;;  %2766 = vst [vmem:[#allocation7_spill] sm:$0xff] %v1788_v48 }
  0x13   : > { %416 = vperm.xlu1 %1599, %v1550_v3   ;;  %340 = vperm.xlu0 %1598, %v1546_v4   ;;  %2761 = vst [vmem:[#allocation2_spill] sm:$0xff] %v1671_v5  ;;  %v279_v6 = vcombine.high %v1671_v5, %v1671_v5  ;;  %v1552_v16 = vld [vmem:[%s2650_s2 + $0x1c] sm:$0xf]  ;;  %v1555_v17 = vld [vmem:[%s2650_s2 + $0x28] sm:$0xf]  ;;  %v1797_v52 = vsub.s32 0, %v292_v47 }
  0x14   : > { %v1571_v18 = vld [vmem:[%s2650_s2 + $0x68] sm:$0xf]  ;;  %v1575_v19 = vld [vmem:[%s2650_s2 + $0x78] sm:$0xf]  ;;  %v1577_v20 = vld [vmem:[%s2650_s2 + $0x80] sm:$0xf] }
  0x15   : > { %v1578_v21 = vld [vmem:[%s2650_s2 + $0x84] sm:$0xf]  ;;  %v1556_v22 = vld [vmem:[%s2650_s2 + $0x2c] sm:$0xf]  ;;  %v1576_v24 = vld [vmem:[%s2650_s2 + $0x7c] sm:$0xf]  ;;  %v397_v4 = vrot.slane %v1671_v5, %v1797_v52 }
  0x16   : > { %v1572_v23 = vld [vmem:[%s2650_s2 + $0x6c] sm:$0xf]  ;;  %v1579_v25 = vld [vmem:[%s2650_s2 + $0x88] sm:$0xf]  ;;  %v1557_v27 = vld [vmem:[%s2650_s2 + $0x30] sm:$0xf] }
  0x17   : > { %281 = vrot.lane.b32.xlu0 %v1671_v5, %s1611_s29  ;;  %283 = vrot.lane.b32.xlu1 %v279_v6, %s1611_s29  ;;  %v1580_v26 = vld [vmem:[%s2650_s2 + $0x8c] sm:$0xf]  ;;  %v1558_v28 = vld [vmem:[%s2650_s2 + $0x34] sm:$0xf]  ;;  %2769 = vst [vmem:[#allocation10_spill] sm:$0xff] %v1797_v52  ;;  %v1799_v53 = vsub.s32 1, %v292_v47 }
  0x18   : > { %v1561_v29 = vld [vmem:[%s2650_s2 + $0x40] sm:$0xf]  ;;  %v1562_v30 = vld [vmem:[%s2650_s2 + $0x44] sm:$0xf]  ;;  %v1559_v31 = vld [vmem:[%s2650_s2 + $0x38] sm:$0xf] }
  0x19   : > { %v1563_v32 = vld [vmem:[%s2650_s2 + $0x48] sm:$0xf]  ;;  %v1565_v33 = vld [vmem:[%s2650_s2 + $0x50] sm:$0xf]  ;;  %v1566_v34 = vld [vmem:[%s2650_s2 + $0x54] sm:$0xf] }
  0x1a   : > { %v1560_v35 = vld [vmem:[%s2650_s2 + $0x3c] sm:$0xf]  ;;  %v1564_v36 = vld [vmem:[%s2650_s2 + $0x4c] sm:$0xf]  ;;  %v1567_v37 = vld [vmem:[%s2650_s2 + $0x58] sm:$0xf] }
  0x1b   : > { %357 = vperm.xlu0 %1598, %v1547_v7   ;;  %443 = vperm.xlu1 %1599, %v1551_v8   ;;  %v1568_v38 = vld [vmem:[%s2650_s2 + $0x5c] sm:$0xf]  ;;  %v199_v39 = vld [vmem:[%s2651_s3] sm:$0xf]  ;;  %2770 = vst [vmem:[#allocation11_spill] sm:$0xff] %v1799_v53  ;;  %vm287_vm0 = vcmp.lt.s32.totalorder %v1788_v48, 1 }
  0x1c   : > { %v200_v51 = vld [vmem:[%s2649_s1] sm:$0x3]  ;;  %v1812_v58 = vsub.s32 5, %v292_v47  ;;  %v1818_v61 = vsub.s32 2, %v292_v47  ;;  %v1820_v62 = vsub.s32 4, %v292_v47  ;;  %v1822_v63 = vsub.s32 6, %v292_v47 }
  0x1d   : > { %v1803_v54 = vrot.slane %v200_v51, %v1797_v52  ;;  %v1806_v55 = vrot.slane %v200_v51, %v1799_v53  ;;  %vm307_vm1 = vcmp.lt.s32.totalorder %v1788_v48, 127  ;;  %s1613_s14 = smov 16   ;;  %s1614_s17 = smov 112   ;;  %vm569_vm2 = vcmp.lt.s32.totalorder %v1788_v48, 16 }
  0x1e   : > { %2775 = vst [vmem:[#allocation16_spill] sm:$0xff] %v1812_v58  ;;  %2776 = vst [vmem:[#allocation17_spill] sm:$0xff] %v1818_v61  ;;  %v426_v7 = vrot.slane %v1671_v5, %v1812_v58  ;;  %v401_v8 = vrot.slane %v1671_v5, %v1820_v62  ;;  %vm803_vm3 = vcmp.lt.s32.totalorder %v1788_v48, 112 }
  0x1f   : > { %499 = vperm.xlu0 %1598, %v1553_v9   ;;  %514 = vperm.xlu1 %1599, %v1554_v10   ;;  %2771 = vst [vmem:[#allocation12_spill] sm:$0xff] %v1803_v54  ;;  %2772 = vst [vmem:[#allocation13_spill] sm:$0xff] %v1806_v55  ;;  %v449_v9 = vrot.slane %v1671_v5, %v1818_v61  ;;  %v453_v10 = vrot.slane %v1671_v5, %v1822_v63 }
  0x20   : > { %2777 = vst [vmem:[#allocation18_spill] sm:$0xff] %v1820_v62  ;;  %2778 = vst [vmem:[#allocation19_spill] sm:$0xff] %v1822_v63 }
  0x23   : > { %695 = vperm.xlu0 %1598, %v1569_v11   ;;  %702 = vperm.xlu1 %1599, %v1570_v12   ;;  %v1543_v11 = vld [vmem:[%s2649_s1 + $0x2] sm:$0x3] }
  0x27   : > { %729 = vperm.xlu0 %1598, %v1573_v13   ;;  %736 = vperm.xlu1 %1599, %v1574_v14  }
  0x2b   : > { %303 = vrot.lane.b32.xlu0 %v1671_v5, %s1612_s22  ;;  %305 = vrot.lane.b32.xlu1 %v279_v6, %s1612_s22  ;;  %v422_v6 = vrot.slane %v1671_v5, %v1799_v53 }
  0x2f   : > { %374 = vperm.xlu0 %1598, %v1548_v15   ;;  %470 = vperm.xlu1 %1599, %v1552_v16  }
  0x33   : > { %531 = vperm.xlu0 %1598, %v1555_v17   ;;  %711 = vperm.xlu1 %1599, %v1571_v18   ;;  %v1862_v18 = vrot.slane %v397_v4, %v1797_v52 }
  0x37   : > { %745 = vperm.xlu0 %1598, %v1575_v19   ;;  %765 = vperm.xlu1 %1599, %v1577_v20   ;;  %v1865_v19 = vrot.slane %v422_v6, %v1799_v53  ;;  %v1868_v20 = vrot.slane %v426_v7, %v1799_v53 }
  0x3b   : > { %772 = vperm.xlu0 %1598, %v1578_v21   ;;  %548 = vperm.xlu1 %1599, %v1556_v22   ;;  %v1870_v21 = vsub.s32 3, %v292_v47  ;;  %v1874_v22 = vrot.slane %v1543_v11, %v1797_v52 }
  0x3d   : > { %2783 = vst [vmem:[#allocation24_spill] sm:$0xff] %v1870_v21  ;;  %2784 = vst [vmem:[#allocation25_spill] sm:$0xff] %v1874_v22 }
  0x3f   : > { %720 = vperm.xlu0 %1598, %v1572_v23   ;;  %754 = vperm.xlu1 %1599, %v1576_v24   ;;  %v1877_v23 = vrot.slane %v1543_v11, %v1799_v53  ;;  %v1880_v24 = vrot.slane %v401_v8, %v1797_v52 }
  0x41   : > { %2785 = vst [vmem:[#allocation26_spill] sm:$0xff] %v1877_v23 }
  0x43   : > { %781 = vperm.xlu0 %1598, %v1579_v25   ;;  %790 = vperm.xlu1 %1599, %v1580_v26   ;;  %v1883_v25 = vrot.slane %v449_v9, %v1818_v61  ;;  %v1886_v26 = vrot.slane %v453_v10, %v1818_v61 }
  0x47   : > { %587 = vperm.xlu0 %1598, %v1557_v27   ;;  %594 = vperm.xlu1 %1599, %v1558_v28   ;;  %v1888_v27 = vsub.s32 7, %v292_v47 }
  0x49   : > { %2786 = vst [vmem:[#allocation27_spill] sm:$0xff] %v1888_v27  ;;  %v480_v51 = vrot.slane %v1671_v5, %v1888_v27 }
  0x4b   : > { %621 = vperm.xlu0 %1598, %v1561_v29   ;;  %628 = vperm.xlu1 %1599, %v1562_v30  }
  0x4f   : > { %603 = vperm.xlu0 %1598, %v1559_v31   ;;  %637 = vperm.xlu1 %1599, %v1563_v32  }
  0x53   : > { %657 = vperm.xlu0 %1598, %v1565_v33   ;;  %664 = vperm.xlu1 %1599, %v1566_v34  }
  0x57   : > { %612 = vperm.xlu0 %1598, %v1560_v35   ;;  %646 = vperm.xlu1 %1599, %v1564_v36  }
  0x5b   : > { %673 = vperm.xlu0 %1598, %v1567_v37   ;;  %682 = vperm.xlu1 %1599, %v1568_v38  }
  0x5f   : > { %823 = vperm.xlu0 %1598, %v199_v39  }
  0x8e   : > { %v1780_v40 = vpop.permute.xlu1 %391  ;;  %v1782_v41 = vpop.permute.xlu0 %325 }
  0x8f   : > { %2762 = vst [vmem:[#allocation3_spill] sm:$0xff] %v1780_v40  ;;  %2763 = vst [vmem:[#allocation4_spill] sm:$0xff] %v1782_v41  ;;  %v413_v47 = vmul.f32 %v1880_v24, %v1780_v40 }
  0x92   : > { %v1784_v42 = vpop.permute.xlu1 %416  ;;  %v1786_v43 = vpop.permute.xlu0 %340 }
  0x93   : > { %2764 = vst [vmem:[#allocation5_spill] sm:$0xff] %v1784_v42  ;;  %2765 = vst [vmem:[#allocation6_spill] sm:$0xff] %v1786_v43  ;;  %v437_v34 = vmul.f32 %v1865_v19, %v1784_v42  ;;  %v438_v35 = vmul.f32 %v1868_v20, %v1784_v42 }
  0x96   : > { %v282_v45 = vpop.permute.xlu0 %281  ;;  %v284_v46 = vpop.permute.xlu1 %283 }
  0x97   : > { %v288_v59 = vsel %vm287_vm0, %v282_v45, %v284_v46  ;;  %v289_v60 = vsel %vm287_vm0, %v284_v46, %v282_v45  ;;  %v412_v46 = vmul.f32 %v1862_v18, %v1780_v40 }
  0x98   : > { %v301_v0 = vmul.f32 %v1803_v54, %v289_v60  ;;  %v302_v1 = vmul.f32 %v1806_v55, %v288_v59  ;;  %v476_v59 = vrot.slane %v1671_v5, %v1870_v21 }
  0x9a   : > { %v1790_v49 = vpop.permute.xlu0 %357  ;;  %v1792_v50 = vpop.permute.xlu1 %443  ;;  %v1846_v12 = vrot.slane %v301_v0, %v1797_v52  ;;  %v1849_v13 = vrot.slane %v302_v1, %v1797_v52  ;;  %v1852_v14 = vrot.slane %v301_v0, %v1799_v53  ;;  %v1855_v15 = vrot.slane %v302_v1, %v1799_v53 }
  0x9b   : > { %2767 = vst [vmem:[#allocation8_spill] sm:$0xff] %v1790_v49  ;;  %2768 = vst [vmem:[#allocation9_spill] sm:$0xff] %v1792_v50  ;;  %v1907_v38 = vrot.slane %v301_v0, %v1818_v61  ;;  %v1910_v39 = vrot.slane %v302_v1, %v1818_v61  ;;  %v464_v60 = vmul.f32 %v1883_v25, %v1792_v50 }
  0x9c   : > { %v337_v30 = vmul.f32 %v1849_v13, %v1782_v41  ;;  %v352_v31 = vmul.f32 %v1855_v15, %v1786_v43  ;;  %v336_v32 = vmul.f32 %v1846_v12, %v1782_v41  ;;  %v351_v33 = vmul.f32 %v1852_v14, %v1786_v43 }
  0x9d   : > { %v465_v4 = vmul.f32 %v1886_v26, %v1792_v50 }
  0x9e   : > { %v1808_v56 = vpop.permute.xlu0 %499  ;;  %v1810_v57 = vpop.permute.xlu1 %514  ;;  %v354_v8 = vadd.f32 %v352_v31, %v337_v30  ;;  %v353_v9 = vadd.f32 %v351_v33, %v336_v32  ;;  %v440_v30 = vadd.f32 %v438_v35, %v413_v47  ;;  %v439_v31 = vadd.f32 %v437_v34, %v412_v46 }
  0x9f   : > { %2773 = vst [vmem:[#allocation14_spill] sm:$0xff] %v1808_v56  ;;  %2774 = vst [vmem:[#allocation15_spill] sm:$0xff] %v1810_v57  ;;  %v1947_v32 = vrot.slane %v301_v0, %v1870_v21  ;;  %v1950_v33 = vrot.slane %v302_v1, %v1870_v21 }
  0xa0   : > { %v466_v34 = vadd.f32 %v464_v60, %v439_v31 }
  0xa2   : > { %v1826_v2 = vpop.permute.xlu0 %695  ;;  %v1828_v3 = vpop.permute.xlu1 %702 }
  0xa3   : > { %2779 = vst [vmem:[#allocation20_spill] sm:$0xff] %v1826_v2  ;;  %2780 = vst [vmem:[#allocation21_spill] sm:$0xff] %v1828_v3  ;;  %v706_v31 = vmul.f32 %v1828_v3, %v1855_v15 }
  0xa6   : > { %v1857_v16 = vpop.permute.xlu0 %729  ;;  %v1859_v17 = vpop.permute.xlu1 %736 }
  0xa7   : > { %2781 = vst [vmem:[#allocation22_spill] sm:$0xff] %v1857_v16  ;;  %2782 = vst [vmem:[#allocation23_spill] sm:$0xff] %v1859_v17  ;;  %v740_v40 = vmul.f32 %v1859_v17, %v1868_v20 }
  0xaa   : > { %v304_v28 = vpop.permute.xlu0 %303  ;;  %v306_v29 = vpop.permute.xlu1 %305 }
  0xab   : > { %v308_v36 = vsel %vm307_vm1, %v304_v28, %v306_v29  ;;  %v309_v37 = vsel %vm307_vm1, %v306_v29, %v304_v28 }
  0xac   : > { %v321_v44 = vmul.f32 %v1874_v22, %v308_v36  ;;  %v322_v45 = vmul.f32 %v1877_v23, %v309_v37  ;;  %v368_v36 = vmul.f32 %v1907_v38, %v1790_v49  ;;  %v369_v37 = vmul.f32 %v1910_v39, %v1790_v49 }
  0xad   : > { %v1953_v23 = vrot.slane %v480_v51, %v1870_v21  ;;  %v1956_v22 = vrot.slane %v476_v59, %v1870_v21  ;;  %v467_v49 = vadd.f32 %v465_v4, %v440_v30  ;;  %v698_v51 = vmul.f32 %v1826_v2, %v1846_v12 }
  0xae   : > { %v1926_v6 = vpop.permute.xlu0 %374  ;;  %v1928_v7 = vpop.permute.xlu1 %470  ;;  %v1931_v10 = vrot.slane %v321_v44, %v1797_v52  ;;  %v1934_v11 = vrot.slane %v322_v45, %v1797_v52  ;;  %v1937_v28 = vrot.slane %v321_v44, %v1799_v53  ;;  %v1940_v29 = vrot.slane %v322_v45, %v1799_v53 }
  0xaf   : > { %2787 = vst [vmem:[#allocation28_spill] sm:$0xff] %v1926_v6  ;;  %2788 = vst [vmem:[#allocation29_spill] sm:$0xff] %v1928_v7  ;;  %v371_v55 = vadd.f32 %v369_v37, %v354_v8  ;;  %v370_v35 = vadd.f32 %v368_v36, %v353_v9  ;;  %v699_v59 = vmul.f32 %v1826_v2, %v1849_v13 }
  0xb0   : > { %v511_v0 = vmul.f32 %v1934_v11, %v1808_v56  ;;  %v526_v1 = vmul.f32 %v1940_v29, %v1810_v57  ;;  %v510_v46 = vmul.f32 %v1931_v10, %v1808_v56  ;;  %v525_v47 = vmul.f32 %v1937_v28, %v1810_v57 }
  0xb1   : > { %v1975_v60 = vrot.slane %v321_v44, %v1818_v61  ;;  %v1978_v4 = vrot.slane %v322_v45, %v1818_v61  ;;  %v386_v8 = vmul.f32 %v1950_v33, %v1926_v6  ;;  %v492_v9 = vmul.f32 %v1953_v23, %v1928_v7 }
  0xb2   : > { %v1958_v43 = vpop.permute.xlu0 %531  ;;  %v1960_v41 = vpop.permute.xlu1 %711  ;;  %v385_v36 = vmul.f32 %v1947_v32, %v1926_v6  ;;  %v491_v37 = vmul.f32 %v1956_v22, %v1928_v7  ;;  %v705_v30 = vmul.f32 %v1828_v3, %v1852_v14  ;;  %v732_v2 = vmul.f32 %v1857_v16, %v1862_v18 }
  0xb3   : > { %2789 = vst [vmem:[#allocation30_spill] sm:$0xff] %v1958_v43  ;;  %v733_v57 = vmul.f32 %v1857_v16, %v1880_v24  ;;  %v528_v6 = vadd.f32 %v526_v1, %v511_v0  ;;  %v543_v7 = vmul.f32 %v1978_v4, %v1958_v43  ;;  %v527_v50 = vadd.f32 %v525_v47, %v510_v46 }
  0xb4   : > { %v542_v42 = vmul.f32 %v1975_v60, %v1958_v43  ;;  %v739_v3 = vmul.f32 %v1859_v17, %v1865_v19  ;;  %v2009_v16 = vrot.slane %v321_v44, %v1870_v21  ;;  %v2012_v27 = vrot.slane %v322_v45, %v1870_v21 }
  0xb5   : > { %v388_v0 = vadd.f32 %v386_v8, %v371_v55  ;;  %v494_v1 = vadd.f32 %v492_v9, %v467_v49  ;;  %v387_v63 = vadd.f32 %v385_v36, %v370_v35  ;;  %v493_v61 = vadd.f32 %v491_v37, %v466_v34 }
  0xb6   : > { %v1996_v56 = vpop.permute.xlu0 %745  ;;  %v1998_v54 = vpop.permute.xlu1 %765  ;;  %v545_v43 = vadd.f32 %v543_v7, %v528_v6  ;;  %v544_v62 = vadd.f32 %v542_v42, %v527_v50  ;;  %v708_v17 = vadd.f32 %v706_v31, %v699_v59  ;;  %v742_v5 = vadd.f32 %v740_v40, %v733_v57 }
  0xb7   : > { %2790 = vst [vmem:[#allocation31_spill] sm:$0xff] %v1996_v56  ;;  %2791 = vst [vmem:[#allocation32_spill] sm:$0xff] %v1998_v54  ;;  %v707_v45 = vadd.f32 %v705_v30, %v698_v51  ;;  %v741_v21 = vadd.f32 %v739_v3, %v732_v2  ;;  %v496_v55 = vadd.f32 %v494_v1, %v388_v0 }
  0xb8   : > { %v495_v35 = vadd.f32 %v493_v61, %v387_v63  ;;  %v714_v8 = vmul.f32 %v1960_v41, %v1907_v38  ;;  %v715_v6 = vmul.f32 %v1960_v41, %v1910_v39  ;;  %v748_v42 = vmul.f32 %v1996_v56, %v1883_v25 }
  0xb9   : > { %v749_v50 = vmul.f32 %v1996_v56, %v1886_v26  ;;  %v768_v51 = vmul.f32 %v1998_v54, %v1931_v10  ;;  %v769_v59 = vmul.f32 %v1998_v54, %v1934_v11 }
  0xba   : > { %v2014_v46 = vpop.permute.xlu0 %772  ;;  %v2016_v47 = vpop.permute.xlu1 %548  ;;  %v717_v37 = vadd.f32 %v715_v6, %v708_v17  ;;  %v716_v31 = vadd.f32 %v714_v8, %v707_v45  ;;  %v750_v0 = vadd.f32 %v748_v42, %v741_v21 }
  0xbb   : > { %2792 = vst [vmem:[#allocation33_spill] sm:$0xff] %v2014_v46  ;;  %2793 = vst [vmem:[#allocation34_spill] sm:$0xff] %v2016_v47  ;;  %v560_v58 = vmul.f32 %v2012_v27, %v2016_v47  ;;  %v559_v44 = vmul.f32 %v2009_v16, %v2016_v47  ;;  %v776_v57 = vmul.f32 %v2014_v46, %v1940_v29 }
  0xbc   : > { %v751_v30 = vadd.f32 %v749_v50, %v742_v5 }
  0xbd   : > { %v562_v49 = vadd.f32 %v560_v58, %v545_v43  ;;  %v561_v34 = vadd.f32 %v559_v44, %v544_v62  ;;  %v775_v43 = vmul.f32 %v2014_v46, %v1937_v28  ;;  %v778_v1 = vadd.f32 %v776_v57, %v769_v59 }
  0xbe   : > { %v2030_v7 = vpop.permute.xlu0 %720  ;;  %v2032_v40 = vpop.permute.xlu1 %754 }
  0xbf   : > { %2794 = vst [vmem:[#allocation35_spill] sm:$0xff] %v2030_v7  ;;  %2795 = vst [vmem:[#allocation36_spill] sm:$0xff] %v2032_v40  ;;  %v564_v58 = vadd.f32 %v562_v49, %v496_v55  ;;  %v563_v61 = vadd.f32 %v561_v34, %v495_v35  ;;  %v724_v62 = vmul.f32 %v2030_v7, %v1950_v33 }
  0xc0   : > { %v758_v63 = vmul.f32 %v2032_v40, %v1953_v23  ;;  %v723_v2 = vmul.f32 %v2030_v7, %v1947_v32  ;;  %v757_v3 = vmul.f32 %v2032_v40, %v1956_v22  ;;  %v777_v55 = vadd.f32 %v775_v43, %v768_v51 }
  0xc1   : > { %567 = vrot.lane.b32.xlu1 %v564_v58, %s1613_s14  ;;  %565 = vrot.lane.b32.xlu0 %v563_v61, %s1613_s14  ;;  %v726_v35 = vadd.f32 %v724_v62, %v717_v37 }
  0xc2   : > { %v2052_v9 = vpop.permute.xlu0 %781  ;;  %v2054_v36 = vpop.permute.xlu1 %790  ;;  %v760_v34 = vadd.f32 %v758_v63, %v751_v30  ;;  %v725_v58 = vadd.f32 %v723_v2, %v716_v31  ;;  %v759_v61 = vadd.f32 %v757_v3, %v750_v0 }
  0xc3   : > { %v785_v44 = vmul.f32 %v2052_v9, %v1978_v4  ;;  %v784_v49 = vmul.f32 %v2052_v9, %v1975_v60  ;;  %v794_v5 = vmul.f32 %v2054_v36, %v2012_v27  ;;  %v793_v21 = vmul.f32 %v2054_v36, %v2009_v16 }
  0xc4   : > { %v762_v50 = vadd.f32 %v760_v34, %v726_v35  ;;  %v761_v57 = vadd.f32 %v759_v61, %v725_v58 }
  0xc5   : > { %v787_v46 = vadd.f32 %v785_v44, %v778_v1  ;;  %v786_v54 = vadd.f32 %v784_v49, %v777_v55 }
  0xc6   : > { %v2060_v7 = vpop.permute.xlu0 %587  ;;  %v2062_v17 = vpop.permute.xlu1 %594 }
  0xc7   : > { %2796 = vst [vmem:[#allocation37_spill] sm:$0xff] %v2060_v7  ;;  %2797 = vst [vmem:[#allocation38_spill] sm:$0xff] %v2062_v17  ;;  %v590_v45 = vmul.f32 %v2060_v7, %v1846_v12  ;;  %v591_v8 = vmul.f32 %v2060_v7, %v1849_v13  ;;  %v597_v6 = vmul.f32 %v2062_v17, %v1852_v14 }
  0xc8   : > { %v598_v42 = vmul.f32 %v2062_v17, %v1855_v15  ;;  %v796_v43 = vadd.f32 %v794_v5, %v787_v46  ;;  %v795_v62 = vadd.f32 %v793_v21, %v786_v54 }
  0xc9   : > { %v599_v63 = vadd.f32 %v597_v6, %v590_v45 }
  0xca   : > { %v600_v2 = vadd.f32 %v598_v42, %v591_v8  ;;  %v2076_v3 = vpop.permute.xlu0 %621  ;;  %v2078_v51 = vpop.permute.xlu1 %628  ;;  %v798_v12 = vadd.f32 %v796_v43, %v762_v50  ;;  %v797_v59 = vadd.f32 %v795_v62, %v761_v57 }
  0xcb   : > { %2798 = vst [vmem:[#allocation39_spill] sm:$0xff] %v2076_v3  ;;  %2799 = vst [vmem:[#allocation40_spill] sm:$0xff] %v2078_v51  ;;  %v624_v13 = vmul.f32 %v2076_v3, %v1862_v18  ;;  %v625_v14 = vmul.f32 %v2076_v3, %v1880_v24  ;;  %v631_v15 = vmul.f32 %v2078_v51, %v1865_v19 }
  0xcc   : > { %v632_v54 = vmul.f32 %v2078_v51, %v1868_v20  ;;  %801 = vrot.lane.b32.xlu0 %v798_v12, %s1614_s17  ;;  %799 = vrot.lane.b32.xlu1 %v797_v59, %s1614_s17 }
  0xcd   : > { %v633_v46 = vadd.f32 %v631_v15, %v624_v13 }
  0xce   : > { %v634_v37 = vadd.f32 %v632_v54, %v625_v14  ;;  %v2090_v30 = vpop.permute.xlu0 %603  ;;  %v2092_v31 = vpop.permute.xlu1 %637 }
  0xcf   : > { %2800 = vst [vmem:[#allocation41_spill] sm:$0xff] %v2092_v31  ;;  %v606_v18 = vmul.f32 %v2090_v30, %v1907_v38  ;;  %v607_v19 = vmul.f32 %v2090_v30, %v1910_v39  ;;  %v640_v20 = vmul.f32 %v2092_v31, %v1883_v25  ;;  %v641_v24 = vmul.f32 %v2092_v31, %v1886_v26 }
  0xd1   : > { %v608_v0 = vadd.f32 %v606_v18, %v599_v63  ;;  %v609_v1 = vadd.f32 %v607_v19, %v600_v2  ;;  %v642_v44 = vadd.f32 %v640_v20, %v633_v46  ;;  %v643_v55 = vadd.f32 %v641_v24, %v634_v37  ;;  %v1545_v37 = vld [vmem:[%s2649_s1 + $0x6] sm:$0x3] }
  0xd2   : > { %v2102_v49 = vpop.permute.xlu0 %657  ;;  %v2104_v35 = vpop.permute.xlu1 %664  ;;  %v2161_v20 = vrot.slane %v1545_v37, %v1797_v52  ;;  %v2164_v24 = vrot.slane %v1545_v37, %v1799_v53 }
  0xd3   : > { %v660_v38 = vmul.f32 %v2102_v49, %v1931_v10  ;;  %v661_v39 = vmul.f32 %v2102_v49, %v1934_v11  ;;  %v667_v25 = vmul.f32 %v2104_v35, %v1937_v28  ;;  %v668_v26 = vmul.f32 %v2104_v35, %v1940_v29 }
  0xd4   : > { %2806 = vst [vmem:[#allocation47_spill] sm:$0xff] %v2161_v20  ;;  %2807 = vst [vmem:[#allocation48_spill] sm:$0xff] %v2164_v24 }
  0xd5   : > { %v669_v34 = vadd.f32 %v667_v25, %v660_v38  ;;  %v670_v58 = vadd.f32 %v668_v26, %v661_v39 }
  0xd6   : > { %v2114_v61 = vpop.permute.xlu0 %612  ;;  %v2116_v5 = vpop.permute.xlu1 %646 }
  0xd7   : > { %2801 = vst [vmem:[#allocation42_spill] sm:$0xff] %v2116_v5  ;;  %v615_v21 = vmul.f32 %v2114_v61, %v1947_v32  ;;  %v616_v10 = vmul.f32 %v2114_v61, %v1950_v33  ;;  %v649_v11 = vmul.f32 %v2116_v5, %v1956_v22  ;;  %v650_v28 = vmul.f32 %v2116_v5, %v1953_v23 }
  0xd9   : > { %v617_v45 = vadd.f32 %v615_v21, %v608_v0  ;;  %v618_v29 = vadd.f32 %v616_v10, %v609_v1  ;;  %v651_v8 = vadd.f32 %v649_v11, %v642_v44  ;;  %v652_v6 = vadd.f32 %v650_v28, %v643_v55 }
  0xda   : > { %v2126_v42 = vpop.permute.xlu0 %673  ;;  %v2128_v50 = vpop.permute.xlu1 %682 }
  0xdb   : > { %2802 = vst [vmem:[#allocation43_spill] sm:$0xff] %v2128_v50  ;;  %v676_v32 = vmul.f32 %v2126_v42, %v1975_v60  ;;  %v677_v33 = vmul.f32 %v2126_v42, %v1978_v4  ;;  %v653_v43 = vadd.f32 %v651_v8, %v617_v45  ;;  %v654_v57 = vadd.f32 %v652_v6, %v618_v29  ;;  %v1544_v60 = vld [vmem:[%s2649_s1 + $0x4] sm:$0x3] }
  0xdc   : > { %v685_v23 = vmul.f32 %v2128_v50, %v2009_v16  ;;  %v686_v63 = vmul.f32 %v2128_v50, %v2012_v27  ;;  %v2145_v54 = vrot.slane %v1544_v60, %v1797_v52  ;;  %v2148_v16 = vrot.slane %v1544_v60, %v1799_v53  ;;  %v2808_v29 = vld [vmem:[#allocation2_spill] sm:$0xff] }
  0xdd   : > { %v678_v22 = vadd.f32 %v676_v32, %v669_v34  ;;  %v679_v62 = vadd.f32 %v677_v33, %v670_v58  ;;  %v2809_v32 = vld [vmem:[#allocation18_spill] sm:$0xff] }
  0xde   : > { %v2138_v14 = vpop.permute.xlu0 %823  ;;  %2804 = vst [vmem:[#allocation45_spill] sm:$0xff] %v2145_v54  ;;  %2805 = vst [vmem:[#allocation46_spill] sm:$0xff] %v2148_v16 }
  0xdf   : > { %v687_v2 = vadd.f32 %v685_v23, %v678_v22  ;;  %v688_v12 = vadd.f32 %v686_v63, %v679_v62  ;;  %2803 = vst [vmem:[#allocation44_spill] sm:$0xff] %v2138_v14  ;;  %v2810_v22 = vld [vmem:[#allocation16_spill] sm:$0xff]  ;;  %v2811_v23 = vld [vmem:[#allocation17_spill] sm:$0xff] }
  0xe1   : > { %v689_v59 = vadd.f32 %v687_v2, %v653_v43  ;;  %v690_v13 = vadd.f32 %v688_v12, %v654_v57  ;;  %v2812_v12 = vld [vmem:[#allocation19_spill] sm:$0xff] }
 0x133   : > { %v566_v4 = vpop.permute.xlu0 %565  ;;  %v568_v15 = vpop.permute.xlu1 %567 }
 0x134   : > { %v570_v27 = vsel %vm569_vm2, %v566_v4, %v568_v15  ;;  %v571_v46 = vsel %vm569_vm2, %v568_v15, %v566_v4  ;;  %v2813_v4 = vld [vmem:[#allocation24_spill] sm:$0xff] }
 0x135   : > { %v583_v18 = vmul.f32 %v2145_v54, %v571_v46  ;;  %v584_v19 = vmul.f32 %v2148_v16, %v570_v27  ;;  %v2814_v46 = vld [vmem:[#allocation27_spill] sm:$0xff] }
 0x137   : > { %v691_v38 = vadd.f32 %v689_v59, %v583_v18  ;;  %v692_v39 = vadd.f32 %v690_v13, %v584_v19 }
 0x13e   : > { %v802_v0 = vpop.permute.xlu0 %801  ;;  %v800_v1 = vpop.permute.xlu1 %799 }
 0x13f   : > { %v804_v44 = vsel %vm803_vm3, %v800_v1, %v802_v0  ;;  %v805_v55 = vsel %vm803_vm3, %v802_v0, %v800_v1 }
 0x140   : > { %v817_v25 = vmul.f32 %v2161_v20, %v804_v44  ;;  %v818_v26 = vmul.f32 %v2164_v24, %v805_v55 }
 0x142   : > { %v819_v34 = vadd.f32 %v817_v25, %v691_v38  ;;  %v820_v58 = vadd.f32 %v818_v26, %v692_v39 }
 0x144   : > { %v826_v21 = vadd.f32 %v2138_v14, %v819_v34  ;;  %v827_v10 = vadd.f32 %v2138_v14, %v820_v58  ;;  %v2833_v14 = vld [vmem:[#allocation21_spill] sm:$0xff] }
 0x146   : > { %v828_v11 = vmax.f32 %v826_v21, 0.0  ;;  %v829_v28 = vmax.f32 %v827_v10, 0.0 }
 0x148   : > { %v832_v45 = vcombine.low %v828_v11, %v829_v28 }
 0x14a   : > { %v834_v8 = vadd.f32 %v832_v45, %v2808_v29 }
 0x14c   : > { %838 = vrot.lane.b32.xlu1 %v834_v8, %s1611_s29  ;;  %v836_v6 = vcombine.high %v834_v8, %v834_v8  ;;  %v907_v33 = vrot.slane %v834_v8, %v2809_v32  ;;  %v903_v43 = vrot.slane %v834_v8, %v1797_v52  ;;  %v923_v57 = vrot.slane %v834_v8, %v1799_v53 }
 0x14d   : > { %v927_v62 = vrot.slane %v834_v8, %v2810_v22  ;;  %v945_v63 = vrot.slane %v834_v8, %v2811_v23  ;;  %v949_v59 = vrot.slane %v834_v8, %v2812_v12  ;;  %v967_v15 = vrot.slane %v834_v8, %v2813_v4  ;;  %v2831_v12 = vld [vmem:[#allocation30_spill] sm:$0xff] }
 0x14e   : > { %840 = vrot.lane.b32.xlu0 %v836_v6, %s1611_s29  ;;  %v917_v2 = vrot.slane %v907_v33, %v1797_v52  ;;  %v913_v13 = vrot.slane %v903_v43, %v1797_v52  ;;  %v933_v60 = vrot.slane %v923_v57, %v1799_v53  ;;  %v971_v37 = vrot.slane %v834_v8, %v2814_v46  ;;  %v2816_v33 = vld [vmem:[#allocation5_spill] sm:$0xff] }
 0x14f   : > { %v937_v27 = vrot.slane %v927_v62, %v1799_v53  ;;  %v955_v18 = vrot.slane %v945_v63, %v2811_v23  ;;  %v959_v19 = vrot.slane %v949_v59, %v2811_v23  ;;  %v977_v44 = vrot.slane %v967_v15, %v2813_v4  ;;  %v2817_v63 = vld [vmem:[#allocation22_spill] sm:$0xff]  ;;  %v2818_v15 = vld [vmem:[#allocation23_spill] sm:$0xff] }
 0x150   : > { %846 = vrot.lane.b32.xlu1 %v834_v8, %s1612_s22  ;;  %v1058_v0 = vmul.f32 %v913_v13, %v2076_v3  ;;  %v1059_v1 = vmul.f32 %v917_v2, %v2076_v3  ;;  %v1060_v55 = vmul.f32 %v933_v60, %v2078_v51  ;;  %v981_v38 = vrot.slane %v971_v37, %v2813_v4  ;;  %v2815_v8 = vld [vmem:[#allocation3_spill] sm:$0xff] }
 0x151   : > { %v1061_v39 = vmul.f32 %v937_v27, %v2078_v51  ;;  %v1064_v26 = vmul.f32 %v955_v18, %v2092_v31  ;;  %v1065_v58 = vmul.f32 %v959_v19, %v2092_v31  ;;  %v1068_v10 = vmul.f32 %v977_v44, %v2116_v5  ;;  %v2830_v51 = vld [vmem:[#allocation15_spill] sm:$0xff] }
 0x152   : > { %848 = vrot.lane.b32.xlu0 %v836_v6, %s1612_s22  ;;  %v1062_v25 = vadd.f32 %v1060_v55, %v1058_v0  ;;  %v1069_v28 = vmul.f32 %v981_v38, %v2116_v5  ;;  %v919_v6 = vmul.f32 %v917_v2, %v2815_v8  ;;  %v939_v43 = vmul.f32 %v937_v27, %v2816_v33  ;;  %v2829_v5 = vld [vmem:[#allocation14_spill] sm:$0xff] }
 0x153   : > { %v1063_v34 = vadd.f32 %v1061_v39, %v1059_v1  ;;  %v918_v57 = vmul.f32 %v913_v13, %v2815_v8  ;;  %v938_v62 = vmul.f32 %v933_v60, %v2816_v33  ;;  %v1107_v59 = vmul.f32 %v917_v2, %v2817_v63 }
 0x154   : > { %v1066_v21 = vadd.f32 %v1064_v26, %v1062_v25  ;;  %v1109_v37 = vmul.f32 %v937_v27, %v2818_v15  ;;  %v1106_v0 = vmul.f32 %v913_v13, %v2817_v63  ;;  %v1108_v1 = vmul.f32 %v933_v60, %v2818_v15  ;;  %v2820_v63 = vld [vmem:[#allocation29_spill] sm:$0xff] }
 0x155   : > { %v1067_v11 = vadd.f32 %v1065_v58, %v1063_v34  ;;  %v941_v55 = vadd.f32 %v939_v43, %v919_v6  ;;  %v940_v39 = vadd.f32 %v938_v62, %v918_v57  ;;  %v2819_v34 = vld [vmem:[#allocation9_spill] sm:$0xff]  ;;  %v983_v60 = vmul.f32 %v981_v38, %v2820_v63  ;;  %v2821_v62 = vld [vmem:[#allocation12_spill] sm:$0xff] }
 0x156   : > { %v2203_v45 = vadd.f32 %v1068_v10, %v1066_v21  ;;  %v1111_v25 = vadd.f32 %v1109_v37, %v1107_v59  ;;  %v1110_v26 = vadd.f32 %v1108_v1, %v1106_v0  ;;  %v961_v58 = vmul.f32 %v959_v19, %v2819_v34  ;;  %v2822_v37 = vld [vmem:[#allocation13_spill] sm:$0xff] }
 0x157   : > { %v2205_v29 = vadd.f32 %v1069_v28, %v1067_v11  ;;  %v960_v21 = vmul.f32 %v955_v18, %v2819_v34  ;;  %v1113_v10 = vmul.f32 %v959_v19, %v1996_v56  ;;  %v1112_v11 = vmul.f32 %v955_v18, %v1996_v56 }
 0x158   : > { %v963_v28 = vadd.f32 %v961_v58, %v941_v55  ;;  %v982_v6 = vmul.f32 %v977_v44, %v2820_v63  ;;  %v1117_v19 = vmul.f32 %v981_v38, %v2032_v40  ;;  %v1116_v18 = vmul.f32 %v977_v44, %v2032_v40  ;;  %v2827_v40 = vld [vmem:[#allocation8_spill] sm:$0xff] }
 0x159   : > { %v962_v2 = vadd.f32 %v960_v21, %v940_v39  ;;  %v1115_v33 = vadd.f32 %v1113_v10, %v1111_v25  ;;  %v1114_v27 = vadd.f32 %v1112_v11, %v1110_v26 }
 0x15a   : > { %v985_v1 = vadd.f32 %v983_v60, %v963_v28 }
 0x15b   : > { %v984_v55 = vadd.f32 %v982_v6, %v962_v2  ;;  %v2229_v39 = vadd.f32 %v1117_v19, %v1115_v33  ;;  %v2231_v25 = vadd.f32 %v1116_v18, %v1114_v27  ;;  %v2824_v18 = vld [vmem:[#allocation6_spill] sm:$0xff] }
 0x1be   : > { %v839_v8 = vpop.permute.xlu1 %838 }
 0x1c0   : > { %v841_v13 = vpop.permute.xlu0 %840 }
 0x1c1   : > { %v842_v43 = vsel %vm287_vm0, %v839_v8, %v841_v13  ;;  %v843_v57 = vsel %vm287_vm0, %v841_v13, %v839_v8 }
 0x1c2   : > { %v844_v59 = vmul.f32 %v843_v57, %v2821_v62  ;;  %v845_v0 = vmul.f32 %v842_v43, %v2822_v37  ;;  %v847_v60 = vpop.permute.xlu1 %846  ;;  %v2823_v57 = vld [vmem:[#allocation4_spill] sm:$0xff]  ;;  %v2826_v37 = vld [vmem:[#allocation26_spill] sm:$0xff] }
 0x1c4   : > { %v2234_v26 = vrot.slane %v844_v59, %v1797_v52  ;;  %v861_v58 = vrot.slane %v845_v0, %v1797_v52  ;;  %v2238_v8 = vrot.slane %v844_v59, %v1799_v53  ;;  %v871_v44 = vrot.slane %v845_v0, %v1799_v53  ;;  %v849_v38 = vpop.permute.xlu0 %848 }
 0x1c5   : > { %v2242_v21 = vrot.slane %v844_v59, %v2811_v23  ;;  %v2245_v10 = vrot.slane %v845_v0, %v2811_v23  ;;  %v2248_v33 = vrot.slane %v844_v59, %v2813_v4  ;;  %v2251_v11 = vrot.slane %v845_v0, %v2813_v4  ;;  %v2825_v0 = vld [vmem:[#allocation25_spill] sm:$0xff] }
 0x1c6   : > { %v2255_v28 = vmul.f32 %v2234_v26, %v2060_v7  ;;  %v2258_v2 = vmul.f32 %v861_v58, %v2060_v7  ;;  %v2262_v27 = vmul.f32 %v2238_v8, %v2062_v17  ;;  %v2265_v13 = vmul.f32 %v871_v44, %v2062_v17  ;;  %v2828_v17 = vld [vmem:[#allocation28_spill] sm:$0xff] }
 0x1c7   : > { %v850_v6 = vsel %vm307_vm1, %v847_v60, %v849_v38  ;;  %v851_v43 = vsel %vm307_vm1, %v849_v38, %v847_v60  ;;  %v863_v19 = vmul.f32 %v861_v58, %v2823_v57  ;;  %v873_v59 = vmul.f32 %v871_v44, %v2824_v18 }
 0x1c8   : > { %v852_v7 = vmul.f32 %v850_v6, %v2825_v0  ;;  %v853_v62 = vmul.f32 %v851_v43, %v2826_v37  ;;  %v885_v63 = vmul.f32 %v2245_v10, %v2827_v40  ;;  %v897_v56 = vmul.f32 %v2251_v11, %v2828_v17 }
 0x1c9   : > { %v875_v34 = vadd.f32 %v873_v59, %v863_v19  ;;  %v862_v15 = vmul.f32 %v2234_v26, %v2823_v57  ;;  %v872_v38 = vmul.f32 %v2238_v8, %v2824_v18  ;;  %v884_v60 = vmul.f32 %v2242_v21, %v2827_v40 }
 0x1ca   : > { %v2286_v6 = vrot.slane %v852_v7, %v1797_v52  ;;  %v2289_v43 = vrot.slane %v853_v62, %v1797_v52  ;;  %v2292_v37 = vrot.slane %v852_v7, %v1799_v53  ;;  %v2295_v19 = vrot.slane %v853_v62, %v1799_v53  ;;  %v2832_v52 = vld [vmem:[#allocation20_spill] sm:$0xff] }
 0x1cb   : > { %v2298_v59 = vrot.slane %v852_v7, %v2811_v23  ;;  %v2301_v0 = vrot.slane %v853_v62, %v2811_v23  ;;  %v2304_v40 = vrot.slane %v852_v7, %v2813_v4  ;;  %v2307_v18 = vrot.slane %v853_v62, %v2813_v4 }
 0x1cc   : > { %v887_v57 = vadd.f32 %v885_v63, %v875_v34  ;;  %v997_v31 = vmul.f32 %v2289_v43, %v2829_v5  ;;  %v1007_v3 = vmul.f32 %v2295_v19, %v2830_v51  ;;  %v874_v46 = vadd.f32 %v872_v38, %v862_v15 }
 0x1cd   : > { %v1019_v22 = vmul.f32 %v2301_v0, %v2831_v12  ;;  %v1031_v23 = vmul.f32 %v2307_v18, %v2016_v47  ;;  %v896_v7 = vmul.f32 %v2248_v33, %v2828_v17  ;;  %v996_v62 = vmul.f32 %v2286_v6, %v2829_v5 }
 0x1ce   : > { %v899_v63 = vadd.f32 %v897_v56, %v887_v57  ;;  %v1009_v34 = vadd.f32 %v1007_v3, %v997_v31  ;;  %v886_v4 = vadd.f32 %v884_v60, %v874_v46  ;;  %v1006_v53 = vmul.f32 %v2292_v37, %v2830_v51  ;;  %v2834_v31 = vld [vmem:[#allocation35_spill] sm:$0xff]  ;;  %v2835_v57 = vld [vmem:[#allocation32_spill] sm:$0xff] }
 0x1cf   : > { %v1018_v15 = vmul.f32 %v2298_v59, %v2831_v12  ;;  %v1030_v38 = vmul.f32 %v2304_v40, %v2016_v47  ;;  %v1093_v32 = vmul.f32 %v861_v58, %v2832_v52  ;;  %v1095_v24 = vmul.f32 %v871_v44, %v2833_v14  ;;  %v2836_v58 = vld [vmem:[#allocation33_spill] sm:$0xff] }
 0x1d0   : > { %v987_v17 = vadd.f32 %v985_v1, %v899_v63  ;;  %v1021_v20 = vadd.f32 %v1019_v22, %v1009_v34  ;;  %v898_v16 = vadd.f32 %v896_v7, %v886_v4  ;;  %v1008_v5 = vadd.f32 %v1006_v53, %v996_v62 }
 0x1d1   : > { %v1097_v56 = vadd.f32 %v1095_v24, %v1093_v32  ;;  %v1099_v3 = vmul.f32 %v2245_v10, %v1960_v41  ;;  %v1103_v46 = vmul.f32 %v2251_v11, %v2834_v31  ;;  %v1123_v60 = vmul.f32 %v2289_v43, %v2835_v57 }
 0x1d2   : > { %v1033_v12 = vadd.f32 %v1031_v23, %v1021_v20  ;;  %v986_v47 = vadd.f32 %v984_v55, %v898_v16  ;;  %v1020_v51 = vadd.f32 %v1018_v15, %v1008_v5  ;;  %v1125_v44 = vmul.f32 %v2295_v19, %v2836_v58 }
 0x1d3   : > { %v1101_v1 = vadd.f32 %v1099_v3, %v1097_v56  ;;  %v1129_v53 = vmul.f32 %v2301_v0, %v2052_v9  ;;  %v1133_v24 = vmul.f32 %v2307_v18, %v2054_v36  ;;  %v1092_v32 = vmul.f32 %v2234_v26, %v2832_v52 }
 0x1d4   : > { %v1035_v22 = vadd.f32 %v1033_v12, %v987_v17  ;;  %v1032_v4 = vadd.f32 %v1030_v38, %v1020_v51  ;;  %v1127_v7 = vadd.f32 %v1125_v44, %v1123_v60  ;;  %v1094_v16 = vmul.f32 %v2238_v8, %v2833_v14 }
 0x1d5   : > { %v1105_v5 = vadd.f32 %v1103_v46, %v1101_v1  ;;  %v1098_v20 = vmul.f32 %v2242_v21, %v1960_v41  ;;  %v1102_v23 = vmul.f32 %v2248_v33, %v2834_v31  ;;  %v1122_v55 = vmul.f32 %v2286_v6, %v2835_v57 }
 0x1d6   : > { %1038 = vrot.lane.b32.xlu0 %v1035_v22, %s1613_s14  ;;  %v1034_v62 = vadd.f32 %v1032_v4, %v986_v47  ;;  %v1131_v26 = vadd.f32 %v1129_v53, %v1127_v7  ;;  %v1096_v17 = vadd.f32 %v1094_v16, %v1092_v32  ;;  %v1124_v51 = vmul.f32 %v2292_v37, %v2836_v58 }
 0x1d7   : > { %v1121_v12 = vadd.f32 %v2229_v39, %v1105_v5  ;;  %v1128_v8 = vmul.f32 %v2298_v59, %v2052_v9  ;;  %v1132_v63 = vmul.f32 %v2304_v40, %v2054_v36  ;;  %v1048_v34 = vadd.f32 %v2262_v27, %v2255_v28 }
 0x1d8   : > { %1036 = vrot.lane.b32.xlu1 %v1034_v62, %s1613_s14  ;;  %v1135_v15 = vadd.f32 %v1133_v24, %v1131_v26  ;;  %v1100_v47 = vadd.f32 %v1098_v20, %v1096_v17  ;;  %v1126_v38 = vadd.f32 %v1124_v51, %v1122_v55  ;;  %v1049_v56 = vadd.f32 %v2265_v13, %v2258_v2  ;;  %v2837_v17 = vld [vmem:[#allocation46_spill] sm:$0xff] }
 0x1d9   : > { %v1050_v39 = vmul.f32 %v2242_v21, %v2090_v30  ;;  %v1051_v3 = vmul.f32 %v2245_v10, %v2090_v30  ;;  %v1054_v46 = vmul.f32 %v2248_v33, %v2114_v61  ;;  %v1055_v28 = vmul.f32 %v2251_v11, %v2114_v61 }
 0x1da   : > { %v1137_v27 = vadd.f32 %v1135_v15, %v1121_v12  ;;  %v1104_v60 = vadd.f32 %v1102_v23, %v1100_v47  ;;  %v1130_v44 = vadd.f32 %v1128_v8, %v1126_v38  ;;  %v1074_v1 = vmul.f32 %v2286_v6, %v2102_v49  ;;  %v2838_v47 = vld [vmem:[#allocation47_spill] sm:$0xff] }
 0x1db   : > { %v1052_v53 = vadd.f32 %v1050_v39, %v1048_v34  ;;  %v1053_v2 = vadd.f32 %v1051_v3, %v1049_v56  ;;  %v1075_v21 = vmul.f32 %v2289_v43, %v2102_v49  ;;  %v1076_v10 = vmul.f32 %v2292_v37, %v2104_v35  ;;  %v2839_v56 = vld [vmem:[#allocation48_spill] sm:$0xff] }
 0x1dc   : > { %1140 = vrot.lane.b32.xlu0 %v1137_v27, %s1614_s17  ;;  %v1120_v33 = vadd.f32 %v2231_v25, %v1104_v60  ;;  %v1134_v13 = vadd.f32 %v1132_v63, %v1130_v44  ;;  %v1077_v11 = vmul.f32 %v2295_v19, %v2104_v35  ;;  %v1080_v6 = vmul.f32 %v2298_v59, %v2126_v42 }
 0x1dd   : > { %v1056_v24 = vadd.f32 %v1054_v46, %v1052_v53  ;;  %v1057_v32 = vadd.f32 %v1055_v28, %v1053_v2  ;;  %v1078_v22 = vadd.f32 %v1076_v10, %v1074_v1  ;;  %v1081_v43 = vmul.f32 %v2301_v0, %v2126_v42  ;;  %v2840_v28 = vld [vmem:[#allocation44_spill] sm:$0xff]  ;;  %v1601_v2 = vld [vmem:[%s1668_s28] sm:$0xff] }
 0x1de   : > { %v1136_v4 = vadd.f32 %v1134_v13, %v1120_v33  ;;  %v1079_v7 = vadd.f32 %v1077_v11, %v1075_v21  ;;  %v1084_v5 = vmul.f32 %v2304_v40, %v2128_v50  ;;  %v1085_v20 = vmul.f32 %v2307_v18, %v2128_v50  ;;  %v2841_v33 = vld [vmem:[#allocation18_spill] sm:$0xff] }
 0x1df   : > { %v1072_v37 = vadd.f32 %v2203_v45, %v1056_v24  ;;  %v1073_v16 = vadd.f32 %v2205_v29, %v1057_v32  ;;  %v1082_v25 = vadd.f32 %v1080_v6, %v1078_v22  ;;  %v2842_v11 = vld [vmem:[#allocation10_spill] sm:$0xff]  ;;  %v2843_v32 = vld [vmem:[#allocation11_spill] sm:$0xff]  ;;  %v2844_v6 = vld [vmem:[#allocation16_spill] sm:$0xff] }
 0x1e0   : > { %1138 = vrot.lane.b32.xlu1 %v1136_v4, %s1614_s17  ;;  %v1083_v19 = vadd.f32 %v1081_v43, %v1079_v7  ;;  %v2845_v7 = vld [vmem:[#allocation17_spill] sm:$0xff] }
 0x1e1   : > { %v1086_v59 = vadd.f32 %v1084_v5, %v1082_v25 }
 0x1e2   : > { %v1087_v23 = vadd.f32 %v1085_v20, %v1083_v19  ;;  %v2847_v20 = vld [vmem:[#allocation24_spill] sm:$0xff] }
 0x1e3   : > { %v1088_v55 = vadd.f32 %v1086_v59, %v1072_v37 }
 0x1e4   : > { %v1089_v62 = vadd.f32 %v1087_v23, %v1073_v16  ;;  %v2846_v16 = vld [vmem:[#allocation19_spill] sm:$0xff] }
 0x248   : > { %v1039_v26 = vpop.permute.xlu0 %1038 }
 0x24a   : > { %v1037_v0 = vpop.permute.xlu1 %1036 }
 0x24b   : > { %v1040_v45 = vsel %vm569_vm2, %v1037_v0, %v1039_v26  ;;  %v1041_v29 = vsel %vm569_vm2, %v1039_v26, %v1037_v0 }
 0x24c   : > { %v1042_v40 = vmul.f32 %v1041_v29, %v2145_v54  ;;  %v1043_v51 = vmul.f32 %v1040_v45, %v2837_v17  ;;  %v2849_v45 = vld [vmem:[#allocation39_spill] sm:$0xff] }
 0x24e   : > { %v1141_v12 = vpop.permute.xlu0 %1140  ;;  %v1090_v34 = vadd.f32 %v1088_v55, %v1042_v40  ;;  %v1091_v15 = vadd.f32 %v1089_v62, %v1043_v51  ;;  %v2848_v55 = vld [vmem:[#allocation27_spill] sm:$0xff] }
 0x252   : > { %v1139_v8 = vpop.permute.xlu1 %1138 }
 0x253   : > { %v1142_v18 = vsel %vm803_vm3, %v1139_v8, %v1141_v12  ;;  %v1143_v63 = vsel %vm803_vm3, %v1141_v12, %v1139_v8  ;;  %v2850_v12 = vld [vmem:[#allocation40_spill] sm:$0xff] }
 0x254   : > { %v1144_v38 = vmul.f32 %v1142_v18, %v2838_v47  ;;  %v1145_v39 = vmul.f32 %v1143_v63, %v2839_v56  ;;  %v2874_v56 = vld [vmem:[#allocation34_spill] sm:$0xff] }
 0x256   : > { %v1146_v3 = vadd.f32 %v1144_v38, %v1090_v34  ;;  %v1147_v46 = vadd.f32 %v1145_v39, %v1091_v15  ;;  %v2851_v15 = vld [vmem:[#allocation41_spill] sm:$0xff] }
 0x258   : > { %v1148_v27 = vadd.f32 %v1146_v3, %v2840_v28  ;;  %v1149_v60 = vadd.f32 %v1147_v46, %v2840_v28 }
 0x25a   : > { %v1150_v44 = vmax.f32 %v1148_v27, 0.0  ;;  %v1151_v1 = vmax.f32 %v1149_v60, 0.0  ;;  %v2852_v27 = vld [vmem:[#allocation42_spill] sm:$0xff] }
 0x25c   : > { %v1154_v53 = vcombine.low %v1150_v44, %v1151_v1 }
 0x25e   : > { %v1156_v21 = vadd.f32 %v1601_v2, %v1154_v53 }
 0x260   : > { %1160 = vrot.lane.b32.xlu1 %v1156_v21, %s1611_s29  ;;  %v1158_v10 = vcombine.high %v1156_v21, %v1156_v21  ;;  %v1229_v13 = vrot.slane %v1156_v21, %v2841_v33  ;;  %v1225_v24 = vrot.slane %v1156_v21, %v2842_v11  ;;  %v1245_v22 = vrot.slane %v1156_v21, %v2843_v32  ;;  %v2854_v33 = vld [vmem:[#allocation5_spill] sm:$0xff] }
 0x261   : > { %v1249_v4 = vrot.slane %v1156_v21, %v2844_v6  ;;  %v1267_v43 = vrot.slane %v1156_v21, %v2845_v7  ;;  %v1271_v25 = vrot.slane %v1156_v21, %v2846_v16  ;;  %v1289_v59 = vrot.slane %v1156_v21, %v2847_v20  ;;  %v2855_v6 = vld [vmem:[#allocation22_spill] sm:$0xff] }
 0x262   : > { %1162 = vrot.lane.b32.xlu0 %v1158_v10, %s1611_s29  ;;  %v1239_v37 = vrot.slane %v1229_v13, %v2842_v11  ;;  %v1235_v5 = vrot.slane %v1225_v24, %v2842_v11  ;;  %v1255_v19 = vrot.slane %v1245_v22, %v2843_v32  ;;  %v1293_v62 = vrot.slane %v1156_v21, %v2848_v55 }
 0x263   : > { %v1259_v23 = vrot.slane %v1249_v4, %v2843_v32  ;;  %v1277_v26 = vrot.slane %v1267_v43, %v2845_v7  ;;  %v1281_v0 = vrot.slane %v1271_v25, %v2845_v7  ;;  %v1299_v51 = vrot.slane %v1289_v59, %v2847_v20  ;;  %v2856_v43 = vld [vmem:[#allocation23_spill] sm:$0xff] }
 0x264   : > { %1168 = vrot.lane.b32.xlu1 %v1156_v21, %s1612_s22  ;;  %v1380_v29 = vmul.f32 %v1235_v5, %v2849_v45  ;;  %v1381_v40 = vmul.f32 %v1239_v37, %v2849_v45  ;;  %v1382_v8 = vmul.f32 %v1255_v19, %v2850_v12  ;;  %v1303_v18 = vrot.slane %v1293_v62, %v2847_v20  ;;  %v2853_v21 = vld [vmem:[#allocation3_spill] sm:$0xff] }
 0x265   : > { %v1383_v63 = vmul.f32 %v1259_v23, %v2850_v12  ;;  %v1386_v38 = vmul.f32 %v1277_v26, %v2851_v15  ;;  %v1387_v3 = vmul.f32 %v1281_v0, %v2851_v15  ;;  %v1390_v60 = vmul.f32 %v1299_v51, %v2852_v27 }
 0x266   : > { %1170 = vrot.lane.b32.xlu0 %v1158_v10, %s1612_s22  ;;  %v1384_v34 = vadd.f32 %v1382_v8, %v1380_v29  ;;  %v1391_v1 = vmul.f32 %v1303_v18, %v2852_v27  ;;  %v1241_v10 = vmul.f32 %v1239_v37, %v2853_v21  ;;  %v1261_v13 = vmul.f32 %v1259_v23, %v2854_v33  ;;  %s197_s22 = scalar_lea.vmem %s2652_s4, %s1583_s25 }
 0x267   : > { %v1385_v39 = vadd.f32 %v1383_v63, %v1381_v40  ;;  %v1240_v24 = vmul.f32 %v1235_v5, %v2853_v21  ;;  %v1260_v22 = vmul.f32 %v1255_v19, %v2854_v33  ;;  %v1429_v4 = vmul.f32 %v1239_v37, %v2855_v6  ;;  %v2857_v40 = vld [vmem:[#allocation9_spill] sm:$0xff]  ;;  %v2858_v63 = vld [vmem:[#allocation31_spill] sm:$0xff]  ;;  %v2861_v21 = vld [vmem:[#allocation12_spill] sm:$0xff] }
 0x268   : > { %v1388_v46 = vadd.f32 %v1386_v38, %v1384_v34  ;;  %v1431_v16 = vmul.f32 %v1259_v23, %v2856_v43  ;;  %v1428_v25 = vmul.f32 %v1235_v5, %v2855_v6  ;;  %v1430_v59 = vmul.f32 %v1255_v19, %v2856_v43  ;;  %v2862_v33 = vld [vmem:[#allocation13_spill] sm:$0xff] }
 0x269   : > { %v1389_v44 = vadd.f32 %v1387_v3, %v1385_v39  ;;  %v1263_v55 = vadd.f32 %v1261_v13, %v1241_v10  ;;  %v1262_v62 = vadd.f32 %v1260_v22, %v1240_v24  ;;  %v1283_v12 = vmul.f32 %v1281_v0, %v2857_v40 }
 0x26a   : > { %v2436_v53 = vadd.f32 %v1390_v60, %v1388_v46  ;;  %v1433_v45 = vadd.f32 %v1431_v16, %v1429_v4  ;;  %v1432_v29 = vadd.f32 %v1430_v59, %v1428_v25  ;;  %v1282_v8 = vmul.f32 %v1277_v26, %v2857_v40  ;;  %v2859_v46 = vld [vmem:[#allocation29_spill] sm:$0xff] }
 0x26b   : > { %v2438_v2 = vadd.f32 %v1391_v1, %v1389_v44  ;;  %v1435_v34 = vmul.f32 %v1281_v0, %v2858_v63  ;;  %v1434_v15 = vmul.f32 %v1277_v26, %v2858_v63  ;;  %v1285_v38 = vadd.f32 %v1283_v12, %v1263_v55  ;;  %v2860_v1 = vld [vmem:[#allocation36_spill] sm:$0xff] }
 0x26c   : > { %v1284_v37 = vadd.f32 %v1282_v8, %v1262_v62  ;;  %v1305_v19 = vmul.f32 %v1303_v18, %v2859_v46  ;;  %v1304_v27 = vmul.f32 %v1299_v51, %v2859_v46  ;;  %v1439_v0 = vmul.f32 %v1303_v18, %v2860_v1  ;;  %v2864_v8 = vld [vmem:[#allocation38_spill] sm:$0xff]  ;;  %v2867_v46 = vld [vmem:[#allocation25_spill] sm:$0xff] }
 0x26d   : > { %v1437_v39 = vadd.f32 %v1435_v34, %v1433_v45  ;;  %v1436_v23 = vadd.f32 %v1434_v15, %v1432_v29  ;;  %v1438_v26 = vmul.f32 %v1299_v51, %v2860_v1  ;;  %v2863_v29 = vld [vmem:[#allocation37_spill] sm:$0xff] }
 0x26e   : > { %v1307_v24 = vadd.f32 %v1305_v19, %v1285_v38  ;;  %v1306_v22 = vadd.f32 %v1304_v27, %v1284_v37  ;;  %v2868_v27 = vld [vmem:[#allocation26_spill] sm:$0xff] }
 0x26f   : > { %v2462_v6 = vadd.f32 %v1439_v0, %v1437_v39  ;;  %v2464_v4 = vadd.f32 %v1438_v26, %v1436_v23  ;;  %v2865_v39 = vld [vmem:[#allocation4_spill] sm:$0xff] }
 0x270   : > { %v2870_v0 = vld [vmem:[#allocation28_spill] sm:$0xff] }
 0x2d2   : > { %v1161_v3 = vpop.permute.xlu1 %1160 }
 0x2d4   : > { %v1163_v5 = vpop.permute.xlu0 %1162 }
 0x2d5   : > { %v1164_v60 = vsel %vm287_vm0, %v1161_v3, %v1163_v5  ;;  %v1165_v44 = vsel %vm287_vm0, %v1163_v5, %v1161_v3  ;;  %v2866_v3 = vld [vmem:[#allocation6_spill] sm:$0xff] }
 0x2d6   : > { %v1166_v10 = vmul.f32 %v1165_v44, %v2861_v21  ;;  %v1167_v13 = vmul.f32 %v1164_v60, %v2862_v33  ;;  %v1169_v15 = vpop.permute.xlu1 %1168  ;;  %v2869_v44 = vld [vmem:[#allocation8_spill] sm:$0xff] }
 0x2d8   : > { %v2467_v43 = vrot.slane %v1166_v10, %v2842_v11  ;;  %v1183_v16 = vrot.slane %v1167_v13, %v2842_v11  ;;  %v2471_v25 = vrot.slane %v1166_v10, %v2843_v32  ;;  %v1193_v51 = vrot.slane %v1167_v13, %v2843_v32  ;;  %v1171_v18 = vpop.permute.xlu0 %1170 }
 0x2d9   : > { %v2475_v59 = vrot.slane %v1166_v10, %v2845_v7  ;;  %v2478_v55 = vrot.slane %v1167_v13, %v2845_v7  ;;  %v2481_v62 = vrot.slane %v1166_v10, %v2847_v20  ;;  %v2484_v45 = vrot.slane %v1167_v13, %v2847_v20 }
 0x2da   : > { %v2488_v40 = vmul.f32 %v2467_v43, %v2863_v29  ;;  %v2491_v12 = vmul.f32 %v1183_v16, %v2863_v29  ;;  %v2495_v63 = vmul.f32 %v2471_v25, %v2864_v8  ;;  %v2498_v34 = vmul.f32 %v1193_v51, %v2864_v8 }
 0x2db   : > { %v1172_v38 = vsel %vm307_vm1, %v1169_v15, %v1171_v18  ;;  %v1173_v37 = vsel %vm307_vm1, %v1171_v18, %v1169_v15  ;;  %v1185_v23 = vmul.f32 %v1183_v16, %v2865_v39  ;;  %v1195_v5 = vmul.f32 %v1193_v51, %v2866_v3 }
 0x2dc   : > { %v1174_v19 = vmul.f32 %v1172_v38, %v2867_v46  ;;  %v1175_v60 = vmul.f32 %v1173_v37, %v2868_v27  ;;  %v1207_v1 = vmul.f32 %v2478_v55, %v2869_v44  ;;  %v1219_v26 = vmul.f32 %v2484_v45, %v2870_v0  ;;  %v2872_v46 = vld [vmem:[#allocation15_spill] sm:$0xff] }
 0x2dd   : > { %v1197_v21 = vadd.f32 %v1195_v5, %v1185_v23  ;;  %v1184_v10 = vmul.f32 %v2467_v43, %v2865_v39  ;;  %v1194_v33 = vmul.f32 %v2471_v25, %v2866_v3  ;;  %v1206_v13 = vmul.f32 %v2475_v59, %v2869_v44  ;;  %v2871_v3 = vld [vmem:[#allocation14_spill] sm:$0xff] }
 0x2de   : > { %v2519_v18 = vrot.slane %v1174_v19, %v2842_v11  ;;  %v2522_v29 = vrot.slane %v1175_v60, %v2842_v11  ;;  %v2525_v8 = vrot.slane %v1174_v19, %v2843_v32  ;;  %v2528_v15 = vrot.slane %v1175_v60, %v2843_v32  ;;  %v2873_v44 = vld [vmem:[#allocation30_spill] sm:$0xff] }
 0x2df   : > { %v2531_v38 = vrot.slane %v1174_v19, %v2845_v7  ;;  %v2534_v37 = vrot.slane %v1175_v60, %v2845_v7  ;;  %v2537_v39 = vrot.slane %v1174_v19, %v2847_v20  ;;  %v2540_v23 = vrot.slane %v1175_v60, %v2847_v20 }
 0x2e0   : > { %v1209_v11 = vadd.f32 %v1207_v1, %v1197_v21  ;;  %v1319_v5 = vmul.f32 %v2522_v29, %v2871_v3  ;;  %v1329_v32 = vmul.f32 %v2528_v15, %v2872_v46  ;;  %v1196_v27 = vadd.f32 %v1194_v33, %v1184_v10 }
 0x2e1   : > { %v1341_v28 = vmul.f32 %v2534_v37, %v2873_v44  ;;  %v1353_v7 = vmul.f32 %v2540_v23, %v2874_v56  ;;  %v1218_v19 = vmul.f32 %v2481_v62, %v2870_v0  ;;  %v1318_v20 = vmul.f32 %v2519_v18, %v2871_v3 }
 0x2e2   : > { %v1221_v60 = vadd.f32 %v1219_v26, %v1209_v11  ;;  %v1331_v1 = vadd.f32 %v1329_v32, %v1319_v5  ;;  %v1208_v21 = vadd.f32 %v1206_v13, %v1196_v27  ;;  %v1328_v47 = vmul.f32 %v2525_v8, %v2872_v46 }
 0x2e3   : > { %v1340_v10 = vmul.f32 %v2531_v38, %v2873_v44  ;;  %v1352_v33 = vmul.f32 %v2537_v39, %v2874_v56  ;;  %v1415_v17 = vmul.f32 %v1183_v16, %v2832_v52  ;;  %v1417_v54 = vmul.f32 %v1193_v51, %v2833_v14 }
 0x2e4   : > { %v1309_v0 = vadd.f32 %v1307_v24, %v1221_v60  ;;  %v1343_v48 = vadd.f32 %v1341_v28, %v1331_v1  ;;  %v1220_v50 = vadd.f32 %v1218_v19, %v1208_v21  ;;  %v1330_v3 = vadd.f32 %v1328_v47, %v1318_v20 }
 0x2e5   : > { %v1419_v26 = vadd.f32 %v1417_v54, %v1415_v17  ;;  %v1421_v13 = vmul.f32 %v2478_v55, %v1960_v41  ;;  %v1425_v11 = vmul.f32 %v2484_v45, %v2834_v31  ;;  %v1445_v5 = vmul.f32 %v2522_v29, %v2835_v57 }
 0x2e6   : > { %v1355_v46 = vadd.f32 %v1353_v7, %v1343_v48  ;;  %v1308_v56 = vadd.f32 %v1306_v22, %v1220_v50  ;;  %v1342_v32 = vadd.f32 %v1340_v10, %v1330_v3  ;;  %v1447_v16 = vmul.f32 %v2528_v15, %v2836_v58 }
 0x2e7   : > { %v1423_v24 = vadd.f32 %v1421_v13, %v1419_v26  ;;  %v1451_v47 = vmul.f32 %v2534_v37, %v2052_v9  ;;  %v1455_v54 = vmul.f32 %v2540_v23, %v2054_v36  ;;  %v1414_v17 = vmul.f32 %v2467_v43, %v2832_v52 }
 0x2e8   : > { %v1357_v28 = vadd.f32 %v1355_v46, %v1309_v0  ;;  %v1354_v51 = vadd.f32 %v1352_v33, %v1342_v32  ;;  %v1449_v27 = vadd.f32 %v1447_v16, %v1445_v5  ;;  %v1416_v48 = vmul.f32 %v2471_v25, %v2833_v14 }
 0x2e9   : > { %v1427_v50 = vadd.f32 %v1425_v11, %v1423_v24  ;;  %v1420_v22 = vmul.f32 %v2475_v59, %v1960_v41  ;;  %v1424_v44 = vmul.f32 %v2481_v62, %v2834_v31  ;;  %v1444_v7 = vmul.f32 %v2519_v18, %v2835_v57  ;;  %v2875_v11 = vld [vmem:[#allocation43_spill] sm:$0xff]  ;;  %v2877_v24 = vld [vmem:[#allocation45_spill] sm:$0xff] }
 0x2ea   : > { %1360 = vrot.lane.b32.xlu0 %v1357_v28, %s1613_s14  ;;  %v1356_v19 = vadd.f32 %v1354_v51, %v1308_v56  ;;  %v1453_v52 = vadd.f32 %v1451_v47, %v1449_v27  ;;  %v1418_v43 = vadd.f32 %v1416_v48, %v1414_v17  ;;  %v1446_v20 = vmul.f32 %v2525_v8, %v2836_v58  ;;  %v2878_v47 = vld [vmem:[#allocation46_spill] sm:$0xff] }
 0x2eb   : > { %v1443_v14 = vadd.f32 %v2462_v6, %v1427_v50  ;;  %v1450_v25 = vmul.f32 %v2531_v38, %v2052_v9  ;;  %v1454_v41 = vmul.f32 %v2537_v39, %v2054_v36  ;;  %v1370_v31 = vadd.f32 %v2495_v63, %v2488_v40  ;;  %v2879_v50 = vld [vmem:[#allocation47_spill] sm:$0xff] }
 0x2ec   : > { %1358 = vrot.lane.b32.xlu1 %v1356_v19, %s1613_s14  ;;  %v1457_v57 = vadd.f32 %v1455_v54, %v1453_v52  ;;  %v1422_v60 = vadd.f32 %v1420_v22, %v1418_v43  ;;  %v1448_v1 = vadd.f32 %v1446_v20, %v1444_v7  ;;  %v1371_v21 = vadd.f32 %v2498_v34, %v2491_v12  ;;  %v2881_v43 = vld [vmem:[#allocation44_spill] sm:$0xff] }
 0x2ed   : > { %v1372_v58 = vmul.f32 %v2475_v59, %v2090_v30  ;;  %v1373_v9 = vmul.f32 %v2478_v55, %v2090_v30  ;;  %v1376_v36 = vmul.f32 %v2481_v62, %v2114_v61  ;;  %v1377_v6 = vmul.f32 %v2484_v45, %v2114_v61 }
 0x2ee   : > { %v1459_v40 = vadd.f32 %v1457_v57, %v1443_v14  ;;  %v1426_v63 = vadd.f32 %v1424_v44, %v1422_v60  ;;  %v1452_v10 = vadd.f32 %v1450_v25, %v1448_v1  ;;  %v1396_v33 = vmul.f32 %v2519_v18, %v2102_v49  ;;  %v2880_v44 = vld [vmem:[#allocation48_spill] sm:$0xff] }
 0x2ef   : > { %v1374_v0 = vadd.f32 %v1372_v58, %v1370_v31  ;;  %v1375_v12 = vadd.f32 %v1373_v9, %v1371_v21  ;;  %v1397_v59 = vmul.f32 %v2522_v29, %v2102_v49  ;;  %v1398_v30 = vmul.f32 %v2525_v8, %v2104_v35 }
 0x2f0   : > { %1462 = vrot.lane.b32.xlu0 %v1459_v40, %s1614_s17  ;;  %v1442_v55 = vadd.f32 %v2464_v4, %v1426_v63  ;;  %v1456_v62 = vadd.f32 %v1454_v41, %v1452_v10  ;;  %v1399_v61 = vmul.f32 %v2528_v15, %v2104_v35  ;;  %v1402_v18 = vmul.f32 %v2531_v38, %v2126_v42 }
 0x2f1   : > { %v1378_v45 = vadd.f32 %v1376_v36, %v1374_v0  ;;  %v1379_v34 = vadd.f32 %v1377_v6, %v1375_v12  ;;  %v1400_v3 = vadd.f32 %v1398_v30, %v1396_v33  ;;  %v1403_v49 = vmul.f32 %v2534_v37, %v2126_v42 }
 0x2f2   : > { %v1458_v26 = vadd.f32 %v1456_v62, %v1442_v55  ;;  %v1401_v13 = vadd.f32 %v1399_v61, %v1397_v59  ;;  %v1406_v5 = vmul.f32 %v2537_v39, %v2875_v11  ;;  %v1407_v15 = vmul.f32 %v2540_v23, %v2875_v11 }
 0x2f3   : > { %v1394_v29 = vadd.f32 %v2436_v53, %v1378_v45  ;;  %v1395_v8 = vadd.f32 %v2438_v2, %v1379_v34  ;;  %v1404_v4 = vadd.f32 %v1402_v18, %v1400_v3 }
 0x2f4   : > { %1460 = vrot.lane.b32.xlu1 %v1458_v26, %s1614_s17  ;;  %v1405_v35 = vadd.f32 %v1403_v49, %v1401_v13 }
 0x2f5   : > { %v1408_v38 = vadd.f32 %v1406_v5, %v1404_v4 }
 0x2f6   : > { %v1409_v46 = vadd.f32 %v1407_v15, %v1405_v35 }
 0x2f7   : > { %v1410_v56 = vadd.f32 %v1408_v38, %v1394_v29 }
 0x2f8   : > { %v1411_v32 = vadd.f32 %v1409_v46, %v1395_v8 }
 0x35c   : > { %v1361_v16 = vpop.permute.xlu0 %1360 }
 0x35e   : > { %v1359_v42 = vpop.permute.xlu1 %1358 }
 0x35f   : > { %v1362_v53 = vsel %vm569_vm2, %v1359_v42, %v1361_v16  ;;  %v1363_v2 = vsel %vm569_vm2, %v1361_v16, %v1359_v42 }
 0x360   : > { %v1364_v39 = vmul.f32 %v1363_v2, %v2877_v24  ;;  %v1365_v54 = vmul.f32 %v1362_v53, %v2878_v47 }
 0x362   : > { %v1463_v17 = vpop.permute.xlu0 %1462  ;;  %v1412_v27 = vadd.f32 %v1410_v56, %v1364_v39  ;;  %v1413_v48 = vadd.f32 %v1411_v32, %v1365_v54 }
 0x366   : > { %v1461_v28 = vpop.permute.xlu1 %1460 }
 0x367   : > { %v1464_v23 = vsel %vm803_vm3, %v1461_v28, %v1463_v17  ;;  %v1465_v51 = vsel %vm803_vm3, %v1463_v17, %v1461_v28 }
 0x368   : > { %v1466_v22 = vmul.f32 %v1464_v23, %v2879_v50  ;;  %v1467_v7 = vmul.f32 %v1465_v51, %v2880_v44 }
 0x36a   : > { %v1468_v19 = vadd.f32 %v1466_v22, %v1412_v27  ;;  %v1469_v52 = vadd.f32 %v1467_v7, %v1413_v48 }
 0x36c   : > { %v1470_v20 = vadd.f32 %v1468_v19, %v2881_v43  ;;  %v1471_v14 = vadd.f32 %v1469_v52, %v2881_v43 }
 0x36e   : > { %v1472_v25 = vmax.f32 %v1470_v20, 0.0  ;;  %v1473_v41 = vmax.f32 %v1471_v14, 0.0 }
 0x370   : > { %v1476_v31 = vcombine.low %v1472_v25, %v1473_v41 }
 0x372   : > { %1478 = vst [vmem:[%s197_s22] sm:$0xff] %v1476_v31 }
 0x373 PF: > { %s14_s15 = sadd.s32 1, %s1608_s15  }
 0x374   : > { %p11_p4 = scmp.ge.s32.totalorder %s14_s15, 4  }
 0x376   :  { %13 = sbr.rel (!%p11_p4) target bundleno = 1 (0x1), region = 104 }

</bundles_post_ra>
